<compile_context>
chip_gen: v6e
topology: v6e:2x2x1
jax: 0.10.0
libtpu: 0.0.40
codegen_flags: <defaults>
</compile_context>

<pallas_src>
import functools

import jax
import jax.numpy as jnp
from jax import lax
from jax.experimental import pallas as pl
from jax.experimental.pallas import tpu as pltpu

NEG_SLOPE = 0.01   # nn.LeakyReLU default
BN_EPS = 1e-5

# bf16 MXU inputs (f32 accumulation) only on a real TPU backend; CPU / interpret
# backends reject BF16xBF16=F32 dots, so they get plain f32 matmuls.
_MXU_DTYPE = jnp.bfloat16 if jax.default_backend() == "tpu" else jnp.float32
_VMEM_LIMIT = 64 * 1024 * 1024


def _leaky(y):
    return jnp.where(y >= 0.0, y, NEG_SLOPE * y)


def _round_up(v, m):
    return (v + m - 1) // m * m


def bn_fold(gamma, beta, mean, var, bias=None, eps=BN_EPS):
    scale = gamma / jnp.sqrt(var + eps)
    if bias is None:
        shift = beta - mean * scale
    else:
        shift = (bias - mean) * scale + beta
    return scale, shift


# ----------------------------------------------------------------------------
# Kernel 1: pairwise NEGATED squared distances, lane-dense, column operand
#           resident per batch, self/padded columns pre-masked for top_k.
# ----------------------------------------------------------------------------
def _pairwise_kernel(xr_ref, xc_ref, sqr_ref, sqc_ref, d_ref, *, n_real):
    xr = xr_ref[0]                                     # [F, tr]   streamed row tile
    xc = xc_ref[0]                                     # [F, Np]   resident per batch
    gram = lax.dot_general(xr, xc, (((0,), (0,)), ((), ())),
                           preferred_element_type=jnp.float32)        # [tr, Np]
    neg = 2.0 * gram - sqr_ref[0] - sqc_ref[0]         # negated squared distance
    tr = neg.shape[0]
    rows = lax.broadcasted_iota(jnp.int32, neg.shape, 0) + pl.program_id(1) * tr
    cols = lax.broadcasted_iota(jnp.int32, neg.shape, 1)
    mask = (rows == cols) | (cols >= n_real)           # self + padded columns
    d_ref[0] = jnp.where(mask, jnp.float32(-1e30), neg)


def pairwise_neg_dist(x):
    """x: [B, F, N] channel-major -> negated squared distances [B, Np, Np]
    (self / padded columns at -1e30) so lax.top_k selects the kNN directly."""
    B, F, N = x.shape
    if N < 128:
        n_pad, tr = N, N
    else:
        n_pad = _round_up(N, 128)
        tr = 512 if n_pad % 512 == 0 else (256 if n_pad % 256 == 0 else 128)
    xp = jnp.pad(x.astype(jnp.float32), ((0, 0), (0, 0), (0, n_pad - N)))
    sq = jnp.sum(xp * xp, axis=1)                      # [B, Np]  (hoisted out of kernel)

    kern = functools.partial(_pairwise_kernel, n_real=N)
    # TODO(synk): distances stay f32 so kNN ordering matches the torch reference;
    # bf16 Gram operands (v6e/v7x win) only after validating ordering on real data.
    # TODO(synk): for large N, fuse a streaming per-row top-k into this kernel so
    # the [B, N, N] matrix never round-trips HBM.
    return pl.pallas_call(
        kern,
        grid=(B, n_pad // tr),
        in_specs=[pl.BlockSpec((1, F, tr), lambda b, i: (b, 0, i)),     # streamed rows
                  pl.BlockSpec((1, F, n_pad), lambda b, i: (b, 0, 0)),  # resident cols
                  pl.BlockSpec((1, tr, 1), lambda b, i: (b, i, 0)),
                  pl.BlockSpec((1, 1, n_pad), lambda b, i: (b, 0, 0))],
        out_specs=pl.BlockSpec((1, tr, n_pad), lambda b, i: (b, i, 0)),
        out_shape=jax.ShapeDtypeStruct((B, n_pad, n_pad), jnp.float32),
        compiler_params=pltpu.CompilerParams(
            dimension_semantics=("parallel", "parallel"),
            vmem_limit_bytes=_VMEM_LIMIT),
    )(xp, xp, sq[:, :, None], sq[:, None, :])


# ----------------------------------------------------------------------------
# Edge-feature matrix build (kNN gather stays in XLA)
# ----------------------------------------------------------------------------
def build_edge_matrix(x, k):
    """x: [B, F, N] -> X: [B, 2F*k, N] with X[b, c*k+t, n] = ee[b, c, n, t]
    where ee = [central | neighbors - central] (torch get_edge_features)."""
    B, F, N = x.shape
    neg_dist = pairwise_neg_dist(x)                    # Pallas, diag/pad pre-masked
    _, idx = lax.top_k(neg_dist[:, :N, :], k)          # [B, N, k] (self excluded)
    xt = jnp.transpose(x, (0, 2, 1))                   # [B, N, F]
    # TODO(synk): neighbor gather stays in XLA; a scalar-prefetch / manual-DMA gather
    # inside the edge-conv kernel would avoid materializing the [B, N, k, F] copy.
    nbr = jax.vmap(lambda xb, ib: xb[ib])(xt, idx)     # [B, N, k, F]
    central = jnp.broadcast_to(x[:, :, None, :], (B, F, k, N)).reshape(B, F * k, N)
    diff = (jnp.transpose(nbr, (0, 3, 2, 1)) - x[:, :, None, :]).reshape(B, F * k, N)
    return jnp.concatenate([central, diff], axis=1)    # [B, 2F*k, N]


# ----------------------------------------------------------------------------
# Kernel 2: fused edge-conv branch
#   z = [W1s; W2a_s] @ x          (single merged matmul on the streamed tile)
#   h = leaky(z[:C1] + t1)        (inte_conv_hk, all sliding windows, BN folded)
#   y = relu(z[C1:] + W2b_s @ h + t2)   (conv2 + BN2d, view-chain folded into W2b)
#   o = leaky(y * su + tu)        (BN1d(Fout) of upsample_cov + LeakyReLU)
# ----------------------------------------------------------------------------
def _edgeconv_kernel(x_ref, w12_ref, t1_ref, w2b_ref, t2_ref, su_ref, tu_ref,
                     o_ref, *, c1):
    x = x_ref[0]                                                       # [Dee, tn]
    z = jnp.dot(w12_ref[...], x, preferred_element_type=jnp.float32)   # [C1+C2, tn]
    h = _leaky(z[:c1] + t1_ref[...])
    y = z[c1:] + jnp.dot(w2b_ref[...], h.astype(w2b_ref.dtype),
                         preferred_element_type=jnp.float32)
    y = jnp.maximum(y + t2_ref[...], 0.0)                              # conv2 BN + ReLU
    o_ref[0] = _leaky(y * su_ref[...] + tu_ref[...])                   # up_bn + Leaky


def _choose_edge_tile(n, dee, c2, itemsize, budget=24 * 1024 * 1024):
    if n <= 256:
        return n                                       # full extent (always legal)
    n128 = _round_up(n, 128)
    per_col = 2 * (dee * itemsize + c2 * 4)            # double-buffered in + out cols
    t_max = int(max(128, min(2048, (budget // per_col) // 128 * 128)))
    if n128 <= t_max:
        return n128
    steps = -(-n128 // t_max)                          # minimal-padding 128-aligned tile
    return _round_up(-(-n128 // steps), 128)


def upsample_edge_conv(x, p, Fin, Fout, k):
    """upsample_edgeConv + BN1d(Fout) + LeakyReLU, fused.  x:[B,Fin,N] -> [B,Fout,2N]."""
    B, _, N = x.shape
    C2in = 2 * Fin
    kw = k // 2 + 1
    w_out = k - kw + 1
    assert 2 * w_out == k, "torch view chain in upsample_edgeConv requires even k"
    Dee = C2in * k
    C1 = w_out * 4 * Fin
    C2 = 2 * Fout

    X = build_edge_matrix(x, k)                        # [B, Dee, N]

    # --- inte_conv_hk expressed as ONE matmul over all sliding windows ----------
    # w1[c*k + t, j*4Fin + o] = inte_w[o, c, 0, t - j]  (zero outside the window)
    wk = p["inte_w"][:, :, 0, :]                       # [4Fin, 2Fin, kw]
    w1 = jnp.concatenate(
        [jnp.transpose(jnp.pad(wk, ((0, 0), (0, 0), (j, k - kw - j))),
                       (1, 2, 0)).reshape(Dee, 4 * Fin)
         for j in range(w_out)], axis=1)               # [Dee, C1]
    s1, t1 = bn_fold(*p["inte_bn"], bias=p["inte_b"])
    s1a = jnp.tile(s1, w_out)[:, None]                 # column j*4Fin + o -> s1[o]
    t1a = jnp.tile(t1, w_out)[:, None]

    # --- conv2 weight split into the ee part and the inte part (row-permuted) ---
    w2 = p["conv2_w"][:, :, 0, :]                      # [C2, 2Fin, 2k]
    w2a = w2[:, :, :k].reshape(C2, Dee)                # ee part: column c*k + t
    # inte part: column j*4Fin + 2c + r  <-  conv2_w[:, c, k + r*w_out + j]
    w2b = jnp.transpose(w2[:, :, k:].reshape(C2, C2in, 2, w_out),
                        (3, 1, 2, 0)).reshape(C1, C2).T                # [C2, C1]
    s2, t2 = bn_fold(*p["conv2_bn"], bias=p["conv2_b"])
    su, tu = bn_fold(*p["up_bn"])

    # BN scales are linear before the nonlinearities -> fold into the weights
    # (all folds in f32; MXU-dtype cast only at the very end).
    w1s = w1.T * s1a                                   # [C1, Dee]
    w2a_s = w2a * s2[:, None]
    w2b_s = w2b * s2[:, None]
    w12 = jnp.concatenate([w1s, w2a_s], axis=0)        # single resident [(C1+C2), Dee]
    su2 = jnp.repeat(su, 2)[:, None]                   # up_bn channel f covers 2f, 2f+1
    tu2 = jnp.repeat(tu, 2)[:, None]

    itemsize = jnp.dtype(_MXU_DTYPE).itemsize
    tn = _choose_edge_tile(N, Dee, C2, itemsize)
    n_pad = _round_up(N, tn)
    Xp = jnp.pad(X, ((0, 0), (0, 0), (0, n_pad - N))).astype(_MXU_DTYPE)

    resident = lambda b, i: (0, 0)
    kern = functools.partial(_edgeconv_kernel, c1=C1)
    # TODO(synk): on v7x, give the resident weight specs pipeline_mode=pl.Buffered(1)
    # to avoid double-buffering constant operands (64 MiB VMEM budget).
    y = pl.pallas_call(
        kern,
        grid=(B, n_pad // tn),
        in_specs=[
            pl.BlockSpec((1, Dee, tn), lambda b, i: (b, 0, i)),   # streamed edge tile
            pl.BlockSpec((C1 + C2, Dee), resident),               # [w1s; w2a_s] resident
            pl.BlockSpec((C1, 1), resident),
            pl.BlockSpec((C2, C1), resident),
            pl.BlockSpec((C2, 1), resident),
            pl.BlockSpec((C2, 1), resident),
            pl.BlockSpec((C2, 1), resident),
        ],
        out_specs=pl.BlockSpec((1, C2, tn), lambda b, i: (b, 0, i)),
        out_shape=jax.ShapeDtypeStruct((B, C2, n_pad), jnp.float32),
        compiler_params=pltpu.CompilerParams(
            dimension_semantics=("parallel", "parallel"),
            vmem_limit_bytes=_VMEM_LIMIT),
    )(Xp,
      w12.astype(_MXU_DTYPE),
      t1a.astype(jnp.float32),
      w2b_s.astype(_MXU_DTYPE),
      t2[:, None].astype(jnp.float32),
      su2.astype(jnp.float32),
      tu2.astype(jnp.float32))

    if n_pad != N:
        y = y[:, :, :N]
    # torch: [B, 2Fout, N] --view--> [B, Fout, 2, N] --view--> [B, Fout, 2N]
    # (contiguous reshapes only: no transpose, no extra HBM pass)
    return y.reshape(B, Fout, 2, N).reshape(B, Fout, 2 * N)


# ----------------------------------------------------------------------------
# Kernel 3: fused fc branch  (3x Linear/BN1d/LeakyReLU on the pooled features)
# ----------------------------------------------------------------------------
def _fc_kernel(xm_ref, w1_ref, s1_ref, t1_ref, w2_ref, s2_ref, t2_ref,
               wg_ref, sg_ref, tg_ref, xs_ref, g_ref):
    h = jnp.dot(xm_ref[...], w1_ref[...], preferred_element_type=jnp.float32)
    h = _leaky(h * s1_ref[...] + t1_ref[...])
    xs = jnp.dot(h, w2_ref[...], preferred_element_type=jnp.float32)
    xs = _leaky(xs * s2_ref[...] + t2_ref[...])
    g = jnp.dot(xs, wg_ref[...], preferred_element_type=jnp.float32)
    g = _leaky(g * sg_ref[...] + tg_ref[...])
    xs_ref[...] = xs
    g_ref[...] = g


def fc_branch(x, p):
    """maxpool over N (XLA reduce) + fc (2x Linear/BN1d/Leaky) + g_fc, fused."""
    B, Fin, N = x.shape
    Fout = p["fc2_w"].shape[0]
    # Maxpool as a plain XLA reduce: only the tiny [B, Fin] result enters VMEM
    # (avoids pulling the full [B, Fin, N] tensor into the kernel).
    xm = jnp.max(x, axis=-1).astype(jnp.float32)
    s1, t1 = bn_fold(*p["fc1_bn"], bias=p["fc1_b"])
    s2, t2 = bn_fold(*p["fc2_bn"], bias=p["fc2_b"])
    sg, tg = bn_fold(*p["gfc_bn"], bias=p["gfc_b"])
    return pl.pallas_call(
        _fc_kernel,
        out_shape=(jax.ShapeDtypeStruct((B, Fout), jnp.float32),
                   jax.ShapeDtypeStruct((B, 512), jnp.float32)),
        compiler_params=pltpu.CompilerParams(vmem_limit_bytes=_VMEM_LIMIT),
    )(xm,
      p["fc1_w"].T.astype(jnp.float32), s1[None, :], t1[None, :],
      p["fc2_w"].T.astype(jnp.float32), s2[None, :], t2[None, :],
      p["gfc_w"].T.astype(jnp.float32), sg[None, :], tg[None, :])


# ----------------------------------------------------------------------------
# Full forward
# ----------------------------------------------------------------------------
def bilateral_block_l1_forward(x, p, Fin, Fout, num_k, maxpool=None):
    """x: [B, Fin, N] -> (x_out [B, 2*Fout, 2N], g_out [B, 512+Fout, 2N])"""
    B, _, N = x.shape
    if maxpool is not None:
        # torch .view(B, -1) -> Linear(Fin, Fin) is only valid when maxpool == N
        assert maxpool == N, "bilateral_block_l1 requires maxpool == point_num"
    k = num_k // 2

    xs, g = fc_branch(x, p)                            # [B, Fout], [B, 512]
    x_ec = upsample_edge_conv(x, p, Fin, Fout, k)      # [B, Fout, 2N] (BN+Leaky fused)

    xs_rep = jnp.broadcast_to(xs[:, :, None], (B, Fout, 2 * N))
    g_rep = jnp.broadcast_to(g[:, :, None], (B, 512, 2 * N))
    x_out = jnp.concatenate([xs_rep, x_ec], axis=1)    # [B, 2*Fout, 2N]
    g_out = jnp.concatenate([g_rep, x_ec], axis=1)     # [B, 512+Fout, 2N]
    return x_out, g_out


# ----------------------------------------------------------------------------
# Deterministic parameter init (shapes as in the PyTorch __init__)
# ----------------------------------------------------------------------------
def init_params(key, Fin, Fout, k):
    keys = iter(jax.random.split(key, 64))

    def nrm(shape, s=0.1):
        return s * jax.random.normal(next(keys), shape, dtype=jnp.float32)

    def pos(shape):
        return jax.random.uniform(next(keys), shape, dtype=jnp.float32,
                                  minval=0.5, maxval=1.5)

    def bn(c):
        return (pos((c,)), nrm((c,)), nrm((c,)), pos((c,)))  # gamma, beta, mean, var

    kw = k // 2 + 1
    p = {}
    p["inte_w"] = nrm((4 * Fin, 2 * Fin, 1, kw))       # Conv2d(2Fin, 4Fin, [1, k//2+1])
    p["inte_b"] = nrm((4 * Fin,))
    p["inte_bn"] = bn(4 * Fin)
    p["conv2_w"] = nrm((2 * Fout, 2 * Fin, 1, 2 * k))  # Conv2d(2Fin, 2Fout, [1, 2k])
    p["conv2_b"] = nrm((2 * Fout,))
    p["conv2_bn"] = bn(2 * Fout)
    p["up_bn"] = bn(Fout)                              # upsample_cov BN1d(Fout)
    p["fc1_w"] = nrm((Fin, Fin))                       # Linear(Fin, Fin) + BN1d(Fin)
    p["fc1_b"] = nrm((Fin,))
    p["fc1_bn"] = bn(Fin)
    p["fc2_w"] = nrm((Fout, Fin))                      # Linear(Fin, Fout) + BN1d(Fout)
    p["fc2_b"] = nrm((Fout,))
    p["fc2_bn"] = bn(Fout)
    p["gfc_w"] = nrm((512, Fout))                      # Linear(Fout, 512) + BN1d(512)
    p["gfc_b"] = nrm((512,))
    p["gfc_bn"] = bn(512)
    return p


# ----------------------------------------------------------------------------
if __name__ == "__main__":
    B, Fin, Fout, N = 2, 8, 16, 16
    num_k = 8                 # k = num_k // 2 = 4 (even, as the torch view chain requires)

    key = jax.random.PRNGKey(0)
    kx, kp = jax.random.split(key)
    x = jax.random.normal(kx, (B, Fin, N), dtype=jnp.float32)
    params = init_params(kp, Fin, Fout, num_k // 2)

    fwd = jax.jit(bilateral_block_l1_forward,
                  static_argnames=("Fin", "Fout", "num_k", "maxpool"))
    x_out, g_out = fwd(x, params, Fin=Fin, Fout=Fout, num_k=num_k, maxpool=N)
    jax.block_until_ready((x_out, g_out))

    assert x_out.shape == (B, 2 * Fout, 2 * N), x_out.shape
    assert g_out.shape == (B, 512 + Fout, 2 * N), g_out.shape
    assert jnp.all(jnp.isfinite(x_out)) and jnp.all(jnp.isfinite(g_out))
    print("KERNEL_OK")
</pallas_src>

<mosaic_0001>
module attributes {stable_mosaic.version = 11 : i64} {
  func.func @_pairwise_kernel(%arg0: i32, %arg1: i32, %arg2: memref<1x8x16xf32, #tpu.memory_space<vmem>>, %arg3: memref<1x8x16xf32, #tpu.memory_space<vmem>>, %arg4: memref<1x16x1xf32, #tpu.memory_space<vmem>>, %arg5: memref<1x1x16xf32, #tpu.memory_space<vmem>>, %arg6: memref<1x16x16xf32, #tpu.memory_space<vmem>>) attributes {dimension_semantics = [#tpu.dimension_semantics<parallel>, #tpu.dimension_semantics<parallel>], iteration_bounds = array<i64: 2, 1>, scalar_prefetch = 0 : i64, scratch_operands = 0 : i64, tpu.core_type = #tpu.core_type<tc>, window_params = [{transform_indices = @transform_0, window_bounds = array<i64: 1, 8, 16>}, {transform_indices = @transform_1, window_bounds = array<i64: 1, 8, 16>}, {transform_indices = @transform_2, window_bounds = array<i64: 1, 16, 1>}, {transform_indices = @transform_3, window_bounds = array<i64: 1, 1, 16>}, {transform_indices = @transform_4, window_bounds = array<i64: 1, 16, 16>}]} {
    %c0 = arith.constant 0 : index
    %c0_0 = arith.constant 0 : index
    %c0_1 = arith.constant 0 : index
    %0 = vector.load %arg2[%c0, %c0_0, %c0_1] : memref<1x8x16xf32, #tpu.memory_space<vmem>>, vector<1x8x16xf32>
    %1 = vector.shape_cast %0 : vector<1x8x16xf32> to vector<8x16xf32>
    %c0_2 = arith.constant 0 : index
    %c0_3 = arith.constant 0 : index
    %c0_4 = arith.constant 0 : index
    %2 = vector.load %arg3[%c0_2, %c0_3, %c0_4] : memref<1x8x16xf32, #tpu.memory_space<vmem>>, vector<1x8x16xf32>
    %3 = vector.shape_cast %2 : vector<1x8x16xf32> to vector<8x16xf32>
    %cst = arith.constant dense<0.000000e+00> : vector<16x16xf32>
    %4 = tpu.matmul %1, %3, %cst {dimension_numbers = #tpu.dot_dimension_numbers<[0], [0], [1], [1], [0, 1, 1, 1], [], []>} : vector<8x16xf32>, vector<8x16xf32>, vector<16x16xf32> -> vector<16x16xf32>
    %cst_5 = arith.constant 2.000000e+00 : f32
    %5 = vector.broadcast %cst_5 : f32 to vector<16x16xf32>
    %6 = arith.mulf %5, %4 : vector<16x16xf32>
    %c0_6 = arith.constant 0 : index
    %c0_7 = arith.constant 0 : index
    %c0_8 = arith.constant 0 : index
    %7 = vector.load %arg4[%c0_6, %c0_7, %c0_8] : memref<1x16x1xf32, #tpu.memory_space<vmem>>, vector<1x16x1xf32>
    %8 = vector.shape_cast %7 : vector<1x16x1xf32> to vector<16x1xf32>
    %9 = vector.broadcast %8 : vector<16x1xf32> to vector<16x16xf32>
    %10 = arith.subf %6, %9 : vector<16x16xf32>
    %c0_9 = arith.constant 0 : index
    %c0_10 = arith.constant 0 : index
    %c0_11 = arith.constant 0 : index
    %11 = vector.load %arg5[%c0_9, %c0_10, %c0_11] : memref<1x1x16xf32, #tpu.memory_space<vmem>>, vector<1x1x16xf32>
    %12 = vector.shape_cast %11 : vector<1x1x16xf32> to vector<1x16xf32>
    %13 = vector.broadcast %12 : vector<1x16xf32> to vector<16x16xf32>
    %14 = arith.subf %10, %13 : vector<16x16xf32>
    %15 = tpu.iota {dimensions = array<i32: 0>} : vector<16x16xi32>
    %c16_i32 = arith.constant 16 : i32
    %16 = arith.muli %arg1, %c16_i32 : i32
    %17 = vector.broadcast %16 : i32 to vector<16x16xi32>
    %18 = arith.addi %15, %17 : vector<16x16xi32>
    %19 = tpu.iota {dimensions = array<i32: 1>} : vector<16x16xi32>
    %20 = arith.cmpi eq, %18, %19 : vector<16x16xi32>
    %c16_i32_12 = arith.constant 16 : i32
    %21 = vector.broadcast %c16_i32_12 : i32 to vector<16x16xi32>
    %22 = arith.cmpi sge, %19, %21 : vector<16x16xi32>
    %23 = arith.ori %20, %22 : vector<16x16xi1>
    %cst_13 = arith.constant -1.000000e+30 : f32
    %24 = vector.broadcast %cst_13 : f32 to vector<16x16xf32>
    %25 = arith.select %23, %24, %14 : vector<16x16xi1>, vector<16x16xf32>
    %c0_14 = arith.constant 0 : index
    %c0_15 = arith.constant 0 : index
    %c0_16 = arith.constant 0 : index
    %26 = vector.load %arg6[%c0_14, %c0_15, %c0_16] : memref<1x16x16xf32, #tpu.memory_space<vmem>>, vector<1x16x16xf32>
    %27 = vector.shape_cast %26 : vector<1x16x16xf32> to vector<16x16xf32>
    %28 = vector.shape_cast %25 : vector<16x16xf32> to vector<1x16x16xf32>
    tpu.vector_store %arg6[%c0_14, %c0_15, %c0_16], %28 {strides = array<i32>} : memref<1x16x16xf32, #tpu.memory_space<vmem>>, vector<1x16x16xf32>,
    return
  }
  func.func @transform_0(%arg0: i32, %arg1: i32) -> (i32, i32, i32) {
    %c0_i32 = arith.constant 0 : i32
    %c0_i32_0 = arith.constant 0 : i32
    return %arg0, %c0_i32, %arg1 : i32, i32, i32
  }
  func.func @transform_1(%arg0: i32, %arg1: i32) -> (i32, i32, i32) {
    %c0_i32 = arith.constant 0 : i32
    %c0_i32_0 = arith.constant 0 : i32
    %c0_i32_1 = arith.constant 0 : i32
    return %arg0, %c0_i32, %c0_i32_0 : i32, i32, i32
  }
  func.func @transform_2(%arg0: i32, %arg1: i32) -> (i32, i32, i32) {
    %c0_i32 = arith.constant 0 : i32
    %c0_i32_0 = arith.constant 0 : i32
    return %arg0, %arg1, %c0_i32 : i32, i32, i32
  }
  func.func @transform_3(%arg0: i32, %arg1: i32) -> (i32, i32, i32) {
    %c0_i32 = arith.constant 0 : i32
    %c0_i32_0 = arith.constant 0 : i32
    %c0_i32_1 = arith.constant 0 : i32
    return %arg0, %c0_i32, %c0_i32_0 : i32, i32, i32
  }
  func.func @transform_4(%arg0: i32, %arg1: i32) -> (i32, i32, i32) {
    %c0_i32 = arith.constant 0 : i32
    %c0_i32_0 = arith.constant 0 : i32
    return %arg0, %arg1, %c0_i32 : i32, i32, i32
  }
}

module attributes {stable_mosaic.version = 11 : i64} {
  func.func @_edgeconv_kernel(%arg0: i32, %arg1: i32, %arg2: memref<1x64x16xf32, #tpu.memory_space<vmem>>, %arg3: memref<96x64xf32, #tpu.memory_space<vmem>>, %arg4: memref<64x1xf32, #tpu.memory_space<vmem>>, %arg5: memref<32x64xf32, #tpu.memory_space<vmem>>, %arg6: memref<32x1xf32, #tpu.memory_space<vmem>>, %arg7: memref<32x1xf32, #tpu.memory_space<vmem>>, %arg8: memref<32x1xf32, #tpu.memory_space<vmem>>, %arg9: memref<1x32x16xf32, #tpu.memory_space<vmem>>) attributes {dimension_semantics = [#tpu.dimension_semantics<parallel>, #tpu.dimension_semantics<parallel>], iteration_bounds = array<i64: 2, 1>, scalar_prefetch = 0 : i64, scratch_operands = 0 : i64, tpu.core_type = #tpu.core_type<tc>, window_params = [{transform_indices = @transform_0, window_bounds = array<i64: 1, 64, 16>}, {pipeline_mode = #tpu.pipeline_mode<synchronous>, transform_indices = @transform_1, window_bounds = array<i64: 96, 64>}, {pipeline_mode = #tpu.pipeline_mode<synchronous>, transform_indices = @transform_2, window_bounds = array<i64: 64, 1>}, {pipeline_mode = #tpu.pipeline_mode<synchronous>, transform_indices = @transform_3, window_bounds = array<i64: 32, 64>}, {pipeline_mode = #tpu.pipeline_mode<synchronous>, transform_indices = @transform_4, window_bounds = array<i64: 32, 1>}, {pipeline_mode = #tpu.pipeline_mode<synchronous>, transform_indices = @transform_5, window_bounds = array<i64: 32, 1>}, {pipeline_mode = #tpu.pipeline_mode<synchronous>, transform_indices = @transform_6, window_bounds = array<i64: 32, 1>}, {transform_indices = @transform_7, window_bounds = array<i64: 1, 32, 16>}]} {
    %c0 = arith.constant 0 : index
    %c0_0 = arith.constant 0 : index
    %c0_1 = arith.constant 0 : index
    %0 = vector.load %arg2[%c0, %c0_0, %c0_1] : memref<1x64x16xf32, #tpu.memory_space<vmem>>, vector<1x64x16xf32>
    %1 = vector.shape_cast %0 : vector<1x64x16xf32> to vector<64x16xf32>
    %c0_2 = arith.constant 0 : index
    %c0_3 = arith.constant 0 : index
    %2 = vector.load %arg3[%c0_2, %c0_3] : memref<96x64xf32, #tpu.memory_space<vmem>>, vector<96x64xf32>
    %cst = arith.constant dense<0.000000e+00> : vector<96x16xf32>
    %3 = tpu.matmul %2, %1, %cst {dimension_numbers = #tpu.dot_dimension_numbers<[1], [0], [0], [1], [0, 0, 1, 1], [], []>} : vector<96x64xf32>, vector<64x16xf32>, vector<96x16xf32> -> vector<96x16xf32>
    %4 = vector.extract_strided_slice %3 {offsets = [0, 0], sizes = [64, 16], strides = [1, 1]} : vector<96x16xf32> to vector<64x16xf32>
    %c0_4 = arith.constant 0 : index
    %c0_5 = arith.constant 0 : index
    %5 = vector.load %arg4[%c0_4, %c0_5] : memref<64x1xf32, #tpu.memory_space<vmem>>, vector<64x1xf32>
    %6 = vector.broadcast %5 : vector<64x1xf32> to vector<64x16xf32>
    %7 = arith.addf %4, %6 : vector<64x16xf32>
    %cst_6 = arith.constant 0.000000e+00 : f32
    %8 = vector.broadcast %cst_6 : f32 to vector<64x16xf32>
    %9 = arith.cmpf oge, %7, %8 : vector<64x16xf32>
    %cst_7 = arith.constant 0.00999999977 : f32
    %10 = vector.broadcast %cst_7 : f32 to vector<64x16xf32>
    %11 = arith.mulf %10, %7 : vector<64x16xf32>
    %12 = arith.select %9, %7, %11 : vector<64x16xi1>, vector<64x16xf32>
    %13 = vector.extract_strided_slice %3 {offsets = [64, 0], sizes = [32, 16], strides = [1, 1]} : vector<96x16xf32> to vector<32x16xf32>
    %c0_8 = arith.constant 0 : index
    %c0_9 = arith.constant 0 : index
    %14 = vector.load %arg5[%c0_8, %c0_9] : memref<32x64xf32, #tpu.memory_space<vmem>>, vector<32x64xf32>
    %cst_10 = arith.constant dense<0.000000e+00> : vector<32x16xf32>
    %15 = tpu.matmul %14, %12, %cst_10 {dimension_numbers = #tpu.dot_dimension_numbers<[1], [0], [0], [1], [0, 0, 1, 1], [], []>} : vector<32x64xf32>, vector<64x16xf32>, vector<32x16xf32> -> vector<32x16xf32>
    %16 = arith.addf %13, %15 : vector<32x16xf32>
    %c0_11 = arith.constant 0 : index
    %c0_12 = arith.constant 0 : index
    %17 = vector.load %arg6[%c0_11, %c0_12] : memref<32x1xf32, #tpu.memory_space<vmem>>, vector<32x1xf32>
    %18 = vector.broadcast %17 : vector<32x1xf32> to vector<32x16xf32>
    %19 = arith.addf %16, %18 : vector<32x16xf32>
    %cst_13 = arith.constant 0.000000e+00 : f32
    %20 = vector.broadcast %cst_13 : f32 to vector<32x16xf32>
    %21 = arith.maximumf %19, %20 : vector<32x16xf32>
    %c0_14 = arith.constant 0 : index
    %c0_15 = arith.constant 0 : index
    %22 = vector.load %arg7[%c0_14, %c0_15] : memref<32x1xf32, #tpu.memory_space<vmem>>, vector<32x1xf32>
    %23 = vector.broadcast %22 : vector<32x1xf32> to vector<32x16xf32>
    %24 = arith.mulf %21, %23 : vector<32x16xf32>
    %c0_16 = arith.constant 0 : index
    %c0_17 = arith.constant 0 : index
    %25 = vector.load %arg8[%c0_16, %c0_17] : memref<32x1xf32, #tpu.memory_space<vmem>>, vector<32x1xf32>
    %26 = vector.broadcast %25 : vector<32x1xf32> to vector<32x16xf32>
    %27 = arith.addf %24, %26 : vector<32x16xf32>
    %cst_18 = arith.constant 0.000000e+00 : f32
    %28 = vector.broadcast %cst_18 : f32 to vector<32x16xf32>
    %29 = arith.cmpf oge, %27, %28 : vector<32x16xf32>
    %cst_19 = arith.constant 0.00999999977 : f32
    %30 = vector.broadcast %cst_19 : f32 to vector<32x16xf32>
    %31 = arith.mulf %30, %27 : vector<32x16xf32>
    %32 = arith.select %29, %27, %31 : vector<32x16xi1>, vector<32x16xf32>
    %c0_20 = arith.constant 0 : index
    %c0_21 = arith.constant 0 : index
    %c0_22 = arith.constant 0 : index
    %33 = vector.load %arg9[%c0_20, %c0_21, %c0_22] : memref<1x32x16xf32, #tpu.memory_space<vmem>>, vector<1x32x16xf32>
    %34 = vector.shape_cast %33 : vector<1x32x16xf32> to vector<32x16xf32>
    %35 = vector.shape_cast %32 : vector<32x16xf32> to vector<1x32x16xf32>
    tpu.vector_store %arg9[%c0_20, %c0_21, %c0_22], %35 {strides = array<i32>} : memref<1x32x16xf32, #tpu.memory_space<vmem>>, vector<1x32x16xf32>,
    return
  }
  func.func @transform_0(%arg0: i32, %arg1: i32) -> (i32, i32, i32) {
    %c0_i32 = arith.constant 0 : i32
    %c0_i32_0 = arith.constant 0 : i32
    return %arg0, %c0_i32, %arg1 : i32, i32, i32
  }
  func.func @transform_1(%arg0: i32, %arg1: i32) -> (i32, i32) {
    %c0_i32 = arith.constant 0 : i32
    %c0_i32_0 = arith.constant 0 : i32
    %c0_i32_1 = arith.constant 0 : i32
    return %c0_i32, %c0_i32_0 : i32, i32
  }
  func.func @transform_2(%arg0: i32, %arg1: i32) -> (i32, i32) {
    %c0_i32 = arith.constant 0 : i32
    %c0_i32_0 = arith.constant 0 : i32
    %c0_i32_1 = arith.constant 0 : i32
    return %c0_i32, %c0_i32_0 : i32, i32
  }
  func.func @transform_3(%arg0: i32, %arg1: i32) -> (i32, i32) {
    %c0_i32 = arith.constant 0 : i32
    %c0_i32_0 = arith.constant 0 : i32
    %c0_i32_1 = arith.constant 0 : i32
    return %c0_i32, %c0_i32_0 : i32, i32
  }
  func.func @transform_4(%arg0: i32, %arg1: i32) -> (i32, i32) {
    %c0_i32 = arith.constant 0 : i32
    %c0_i32_0 = arith.constant 0 : i32
    %c0_i32_1 = arith.constant 0 : i32
    return %c0_i32, %c0_i32_0 : i32, i32
  }
  func.func @transform_5(%arg0: i32, %arg1: i32) -> (i32, i32) {
    %c0_i32 = arith.constant 0 : i32
    %c0_i32_0 = arith.constant 0 : i32
    %c0_i32_1 = arith.constant 0 : i32
    return %c0_i32, %c0_i32_0 : i32, i32
  }
  func.func @transform_6(%arg0: i32, %arg1: i32) -> (i32, i32) {
    %c0_i32 = arith.constant 0 : i32
    %c0_i32_0 = arith.constant 0 : i32
    %c0_i32_1 = arith.constant 0 : i32
    return %c0_i32, %c0_i32_0 : i32, i32
  }
  func.func @transform_7(%arg0: i32, %arg1: i32) -> (i32, i32, i32) {
    %c0_i32 = arith.constant 0 : i32
    %c0_i32_0 = arith.constant 0 : i32
    return %arg0, %c0_i32, %arg1 : i32, i32, i32
  }
}

module attributes {stable_mosaic.version = 11 : i64} {
  func.func @_fc_kernel(%arg0: memref<2x8xf32, #tpu.memory_space<vmem>>, %arg1: memref<8x8xf32, #tpu.memory_space<vmem>>, %arg2: memref<1x8xf32, #tpu.memory_space<vmem>>, %arg3: memref<1x8xf32, #tpu.memory_space<vmem>>, %arg4: memref<8x16xf32, #tpu.memory_space<vmem>>, %arg5: memref<1x16xf32, #tpu.memory_space<vmem>>, %arg6: memref<1x16xf32, #tpu.memory_space<vmem>>, %arg7: memref<16x512xf32, #tpu.memory_space<vmem>>, %arg8: memref<1x512xf32, #tpu.memory_space<vmem>>, %arg9: memref<1x512xf32, #tpu.memory_space<vmem>>, %arg10: memref<2x16xf32, #tpu.memory_space<vmem>>, %arg11: memref<2x512xf32, #tpu.memory_space<vmem>>) attributes {dimension_semantics = [], scalar_prefetch = 0 : i64, scratch_operands = 0 : i64, tpu.core_type = #tpu.core_type<tc>} {
    %c0 = arith.constant 0 : index
    %c0_0 = arith.constant 0 : index
    %0 = vector.load %arg0[%c0, %c0_0] : memref<2x8xf32, #tpu.memory_space<vmem>>, vector<2x8xf32>
    %c0_1 = arith.constant 0 : index
    %c0_2 = arith.constant 0 : index
    %1 = vector.load %arg1[%c0_1, %c0_2] : memref<8x8xf32, #tpu.memory_space<vmem>>, vector<8x8xf32>
    %cst = arith.constant dense<0.000000e+00> : vector<2x8xf32>
    %2 = tpu.matmul %0, %1, %cst {dimension_numbers = #tpu.dot_dimension_numbers<[1], [0], [0], [1], [0, 0, 1, 1], [], []>} : vector<2x8xf32>, vector<8x8xf32>, vector<2x8xf32> -> vector<2x8xf32>
    %c0_3 = arith.constant 0 : index
    %c0_4 = arith.constant 0 : index
    %3 = vector.load %arg2[%c0_3, %c0_4] : memref<1x8xf32, #tpu.memory_space<vmem>>, vector<1x8xf32>
    %4 = vector.broadcast %3 : vector<1x8xf32> to vector<2x8xf32>
    %5 = arith.mulf %2, %4 : vector<2x8xf32>
    %c0_5 = arith.constant 0 : index
    %c0_6 = arith.constant 0 : index
    %6 = vector.load %arg3[%c0_5, %c0_6] : memref<1x8xf32, #tpu.memory_space<vmem>>, vector<1x8xf32>
    %7 = vector.broadcast %6 : vector<1x8xf32> to vector<2x8xf32>
    %8 = arith.addf %5, %7 : vector<2x8xf32>
    %cst_7 = arith.constant 0.000000e+00 : f32
    %9 = vector.broadcast %cst_7 : f32 to vector<2x8xf32>
    %10 = arith.cmpf oge, %8, %9 : vector<2x8xf32>
    %cst_8 = arith.constant 0.00999999977 : f32
    %11 = vector.broadcast %cst_8 : f32 to vector<2x8xf32>
    %12 = arith.mulf %11, %8 : vector<2x8xf32>
    %13 = arith.select %10, %8, %12 : vector<2x8xi1>, vector<2x8xf32>
    %c0_9 = arith.constant 0 : index
    %c0_10 = arith.constant 0 : index
    %14 = vector.load %arg4[%c0_9, %c0_10] : memref<8x16xf32, #tpu.memory_space<vmem>>, vector<8x16xf32>
    %cst_11 = arith.constant dense<0.000000e+00> : vector<2x16xf32>
    %15 = tpu.matmul %13, %14, %cst_11 {dimension_numbers = #tpu.dot_dimension_numbers<[1], [0], [0], [1], [0, 0, 1, 1], [], []>} : vector<2x8xf32>, vector<8x16xf32>, vector<2x16xf32> -> vector<2x16xf32>
    %c0_12 = arith.constant 0 : index
    %c0_13 = arith.constant 0 : index
    %16 = vector.load %arg5[%c0_12, %c0_13] : memref<1x16xf32, #tpu.memory_space<vmem>>, vector<1x16xf32>
    %17 = vector.broadcast %16 : vector<1x16xf32> to vector<2x16xf32>
    %18 = arith.mulf %15, %17 : vector<2x16xf32>
    %c0_14 = arith.constant 0 : index
    %c0_15 = arith.constant 0 : index
    %19 = vector.load %arg6[%c0_14, %c0_15] : memref<1x16xf32, #tpu.memory_space<vmem>>, vector<1x16xf32>
    %20 = vector.broadcast %19 : vector<1x16xf32> to vector<2x16xf32>
    %21 = arith.addf %18, %20 : vector<2x16xf32>
    %cst_16 = arith.constant 0.000000e+00 : f32
    %22 = vector.broadcast %cst_16 : f32 to vector<2x16xf32>
    %23 = arith.cmpf oge, %21, %22 : vector<2x16xf32>
    %cst_17 = arith.constant 0.00999999977 : f32
    %24 = vector.broadcast %cst_17 : f32 to vector<2x16xf32>
    %25 = arith.mulf %24, %21 : vector<2x16xf32>
    %26 = arith.select %23, %21, %25 : vector<2x16xi1>, vector<2x16xf32>
    %c0_18 = arith.constant 0 : index
    %c0_19 = arith.constant 0 : index
    %27 = vector.load %arg7[%c0_18, %c0_19] : memref<16x512xf32, #tpu.memory_space<vmem>>, vector<16x512xf32>
    %cst_20 = arith.constant dense<0.000000e+00> : vector<2x512xf32>
    %28 = tpu.matmul %26, %27, %cst_20 {dimension_numbers = #tpu.dot_dimension_numbers<[1], [0], [0], [1], [0, 0, 1, 1], [], []>} : vector<2x16xf32>, vector<16x512xf32>, vector<2x512xf32> -> vector<2x512xf32>
    %c0_21 = arith.constant 0 : index
    %c0_22 = arith.constant 0 : index
    %29 = vector.load %arg8[%c0_21, %c0_22] : memref<1x512xf32, #tpu.memory_space<vmem>>, vector<1x512xf32>
    %30 = vector.broadcast %29 : vector<1x512xf32> to vector<2x512xf32>
    %31 = arith.mulf %28, %30 : vector<2x512xf32>
    %c0_23 = arith.constant 0 : index
    %c0_24 = arith.constant 0 : index
    %32 = vector.load %arg9[%c0_23, %c0_24] : memref<1x512xf32, #tpu.memory_space<vmem>>, vector<1x512xf32>
    %33 = vector.broadcast %32 : vector<1x512xf32> to vector<2x512xf32>
    %34 = arith.addf %31, %33 : vector<2x512xf32>
    %cst_25 = arith.constant 0.000000e+00 : f32
    %35 = vector.broadcast %cst_25 : f32 to vector<2x512xf32>
    %36 = arith.cmpf oge, %34, %35 : vector<2x512xf32>
    %cst_26 = arith.constant 0.00999999977 : f32
    %37 = vector.broadcast %cst_26 : f32 to vector<2x512xf32>
    %38 = arith.mulf %37, %34 : vector<2x512xf32>
    %39 = arith.select %36, %34, %38 : vector<2x512xi1>, vector<2x512xf32>
    %c0_27 = arith.constant 0 : index
    %c0_28 = arith.constant 0 : index
    %40 = vector.load %arg10[%c0_27, %c0_28] : memref<2x16xf32, #tpu.memory_space<vmem>>, vector<2x16xf32>
    tpu.vector_store %arg10[%c0_27, %c0_28], %26 {strides = array<i32>} : memref<2x16xf32, #tpu.memory_space<vmem>>, vector<2x16xf32>,
    %c0_29 = arith.constant 0 : index
    %c0_30 = arith.constant 0 : index
    %41 = vector.load %arg11[%c0_29, %c0_30] : memref<2x512xf32, #tpu.memory_space<vmem>>, vector<2x512xf32>
    tpu.vector_store %arg11[%c0_29, %c0_30], %39 {strides = array<i32>} : memref<2x512xf32, #tpu.memory_space<vmem>>, vector<2x512xf32>,
    return
  }
}

</mosaic_0001>

<bundles_post_ra>
// kernel: tile.13
= control target key start
LH: loop header
LB: loop body
LE: loop exit
PB: predicated region body
PF: predicated region fallthrough
CT: control target
= control target key end

     0   :  { %s22_s0 = inlined_call_operand.vmem [shape: f32[32], index: 0, kind: input, shape index: {}]   ;;  %s23_s1 = inlined_call_operand.vmem [shape: f32[2,32], index: 1, kind: output, shape index: {}]  }
   0x1   :  { %v4_v0 = vld [vmem:[%s22_s0] ss:$0 sm:$0xff] }
   0x2   :  { %5 = vst [vmem:[%s23_s1] sm:$0x3] %v4_v0 }

// kernel: mul.27
= control target key start
LH: loop header
LB: loop body
LE: loop exit
PB: predicated region body
PF: predicated region fallthrough
CT: control target
= control target key end

     0   :  { %vm8_vm0 = vcmask 261120   ;;  %vm14_vm1 = vcmask 523520   ;;  %s42_s0 = inlined_call_operand.vmem [shape: f32[2,32], index: 0, kind: input, shape index: {}]   ;;  %s43_s1 = inlined_call_operand.vmem [shape: f32[64], index: 1, kind: output, shape index: {}]  }
   0x1   :  { %v5_v0 = vld [vmem:[%s42_s0] sm:$0x3]  ;;  %s25_s0 = smov 32  }
   0x2   :  { %6 = vst [vmem:[#allocation1] sm:$0x3] %v5_v0 }
   0x9   :  { %v11_v1 = vld [vmem:[#allocation1 + $0x1] sm:$0x1]   ;;  %v7_v2 = vld [vmem:[#allocation1] sm:$0x1]  }
   0xa   :  { %12 = vrot.lane.b32.xlu0 %v11_v1, %s25_s0  ;;  %9 = vst.msk [vmem:[#allocation0] sm:$0x1] %vm8_vm0, %v7_v2  }
  0x7c   :  { %v13_v3 = vpop.permute.xlu0 %12  }
  0x7d   :  { %15 = vst.msk [vmem:[#allocation0] sm:$0x1] %vm14_vm1, %v13_v3  }
  0x84   :  { %v20_v4 = vld [vmem:[#allocation0] sm:$0x1] }
  0x85   :  { %23 = vst [vmem:[%s43_s1] sm:$0x1] %v20_v4 }

// kernel: tile.0
= control target key start
LH: loop header
LB: loop body
LE: loop exit
PB: predicated region body
PF: predicated region fallthrough
CT: control target
= control target key end

     0   :  { %s355_s8 = smov 125   ;;  %s356_s9 = smov 126   ;;  %vm8_vm0 = vcmask 7168   ;;  %s654_s0 = inlined_call_operand.vmem [shape: f32[2,32], index: 0, kind: input, shape index: {}]   ;;  %s655_s1 = inlined_call_operand.vmem [shape: f32[64,1], index: 1, kind: output, shape index: {}]  }
   0x1   :  { %v5_v0 = vld [vmem:[%s654_s0] sm:$0x3]  ;;  %s354_s0 = smov 127   ;;  %s357_s10 = smov 124  }
   0x2   :  { %6 = vst [vmem:[#allocation0] sm:$0x3] %v5_v0  ;;  %s358_s11 = smov 123   ;;  %s359_s12 = smov 122  }
   0x3   :  { %s360_s13 = smov 121   ;;  %s361_s14 = smov 120  }
   0x4   :  { %s362_s15 = smov 119   ;;  %s363_s16 = smov 118  }
   0x5   :  { %s364_s17 = smov 117   ;;  %s365_s18 = smov 116  }
   0x6   :  { %s366_s19 = smov 115   ;;  %s367_s20 = smov 114  }
   0x7   :  { %s368_s21 = smov 113   ;;  %s369_s22 = smov 112  }
   0x8   :  { %s370_s23 = smov 111   ;;  %s371_s24 = smov 110  }
   0x9   :  { %v12_v1 = vld [vmem:[#allocation0] sm:$0x3]   ;;  %s372_s25 = smov 109   ;;  %s373_s26 = smov 108  }
   0xa   :  { %v28_v2 = vld [vmem:[#allocation0] sm:$0x3]   ;;  %13 = vrot.lane.b32.xlu0 %v12_v1, %s354_s0  ;;  %s374_s27 = smov 107   ;;  %s375_s28 = smov 106  }
   0xb   :  { %29 = vrot.lane.b32.xlu1 %v28_v2, %s355_s8  ;;  %v20_v3 = vld [vmem:[#allocation0] sm:$0x3]   ;;  %s376_s29 = smov 105   ;;  %s377_s30 = smov 104  }
   0xc   :  { %v36_v4 = vld [vmem:[#allocation0] sm:$0x3]   ;;  %s378_s6 = smov 103   ;;  %s379_s7 = smov 102  }
   0xd   :  { %v44_v5 = vld [vmem:[#allocation0] sm:$0x3]   ;;  %s380_s0 = smov 101   ;;  %s381_s8 = smov 100  }
   0xe   :  { %21 = vrot.lane.b32.xlu0 %v20_v3, %s356_s9  ;;  %v52_v6 = vld [vmem:[#allocation0] sm:$0x3]   ;;  %s382_s9 = smov 99  }
   0xf   :  { %37 = vrot.lane.b32.xlu1 %v36_v4, %s357_s10  ;;  %v60_v7 = vld [vmem:[#allocation0] sm:$0x3]   ;;  %s383_s10 = smov 98  }
  0x10   :  { %v68_v8 = vld [vmem:[#allocation0] sm:$0x3]  }
  0x11   :  { %v76_v9 = vld [vmem:[#allocation0] sm:$0x3]  }
  0x12   :  { %45 = vrot.lane.b32.xlu0 %v44_v5, %s358_s11  ;;  %v84_v10 = vld [vmem:[#allocation0] sm:$0x3]   ;;  %s384_s11 = smov 97  }
  0x13   :  { %53 = vrot.lane.b32.xlu1 %v52_v6, %s359_s12  ;;  %v92_v11 = vld [vmem:[#allocation0] sm:$0x3]  }
  0x14   :  { %v100_v12 = vld [vmem:[#allocation0] sm:$0x3]  }
  0x15   :  { %v108_v13 = vld [vmem:[#allocation0] sm:$0x3]  }
  0x16   :  { %61 = vrot.lane.b32.xlu0 %v60_v7, %s360_s13  ;;  %v116_v14 = vld [vmem:[#allocation0] sm:$0x3]  }
  0x17   :  { %69 = vrot.lane.b32.xlu1 %v68_v8, %s361_s14  ;;  %v124_v15 = vld [vmem:[#allocation0] sm:$0x3]  }
  0x18   :  { %v132_v16 = vld [vmem:[#allocation0] sm:$0x3]  }
  0x19   :  { %v140_v17 = vld [vmem:[#allocation0] sm:$0x3]  }
  0x1a   :  { %77 = vrot.lane.b32.xlu0 %v76_v9, %s362_s15  ;;  %v148_v18 = vld [vmem:[#allocation0] sm:$0x3]  }
  0x1b   :  { %85 = vrot.lane.b32.xlu1 %v84_v10, %s363_s16  ;;  %v156_v19 = vld [vmem:[#allocation0] sm:$0x3]  }
  0x1c   :  { %v164_v20 = vld [vmem:[#allocation0] sm:$0x3]  }
  0x1d   :  { %v172_v21 = vld [vmem:[#allocation0] sm:$0x3]  }
  0x1e   :  { %93 = vrot.lane.b32.xlu0 %v92_v11, %s364_s17  ;;  %v180_v22 = vld [vmem:[#allocation0] sm:$0x3]  }
  0x1f   :  { %101 = vrot.lane.b32.xlu1 %v100_v12, %s365_s18  ;;  %v188_v23 = vld [vmem:[#allocation0] sm:$0x3]  }
  0x20   :  { %v196_v24 = vld [vmem:[#allocation0] sm:$0x3]  }
  0x21   :  { %v204_v25 = vld [vmem:[#allocation0] sm:$0x3]  }
  0x22   :  { %109 = vrot.lane.b32.xlu0 %v108_v13, %s366_s19  ;;  %v212_v26 = vld [vmem:[#allocation0] sm:$0x3]  }
  0x23   :  { %117 = vrot.lane.b32.xlu1 %v116_v14, %s367_s20  ;;  %v7_v27 = vld [vmem:[#allocation0] sm:$0x3]  }
  0x24   :  { %9 = vst.msk [vmem:[%s655_s1] sm:$0x1] %vm8_vm0, %v7_v27   ;;  %260 = vst.msk [vmem:[%s655_s1 + $0x1f] sm:$0x2] %vm8_vm0, %v7_v27   ;;  %v220_v28 = vld [vmem:[#allocation0] sm:$0x3]  }
  0x25   :  { %v228_v29 = vld [vmem:[#allocation0] sm:$0x3]  }
  0x26   :  { %125 = vrot.lane.b32.xlu0 %v124_v15, %s368_s21  ;;  %v236_v30 = vld [vmem:[#allocation0] sm:$0x3]  }
  0x27   :  { %133 = vrot.lane.b32.xlu1 %v132_v16, %s369_s22  ;;  %v244_v31 = vld [vmem:[#allocation0] sm:$0x3]  }
  0x28   :  { %v252_v32 = vld [vmem:[#allocation0] sm:$0x3]  }
  0x2a   :  { %141 = vrot.lane.b32.xlu0 %v140_v17, %s370_s23 }
  0x2b   :  { %149 = vrot.lane.b32.xlu1 %v148_v18, %s371_s24 }
  0x2e   :  { %157 = vrot.lane.b32.xlu0 %v156_v19, %s372_s25 }
  0x2f   :  { %165 = vrot.lane.b32.xlu1 %v164_v20, %s373_s26 }
  0x32   :  { %173 = vrot.lane.b32.xlu0 %v172_v21, %s374_s27 }
  0x33   :  { %181 = vrot.lane.b32.xlu1 %v180_v22, %s375_s28 }
  0x36   :  { %189 = vrot.lane.b32.xlu0 %v188_v23, %s376_s29 }
  0x37   :  { %197 = vrot.lane.b32.xlu1 %v196_v24, %s377_s30 }
  0x3a   :  { %205 = vrot.lane.b32.xlu0 %v204_v25, %s378_s6 }
  0x3b   :  { %213 = vrot.lane.b32.xlu1 %v212_v26, %s379_s7 }
  0x3e   :  { %221 = vrot.lane.b32.xlu0 %v220_v28, %s380_s0 }
  0x3f   :  { %229 = vrot.lane.b32.xlu1 %v228_v29, %s381_s8 }
  0x42   :  { %237 = vrot.lane.b32.xlu0 %v236_v30, %s382_s9 }
  0x43   :  { %245 = vrot.lane.b32.xlu1 %v244_v31, %s383_s10 }
  0x46   :  { %253 = vrot.lane.b32.xlu0 %v252_v32, %s384_s11 }
  0x7c   :  { %v14_v33 = vpop.permute.xlu0 %13  }
  0x7d   :  { %v30_v34 = vpop.permute.xlu1 %29   ;;  %261 = vst.msk [vmem:[%s655_s1 + $0x1] sm:$0x1] %vm8_vm0, %v14_v33   ;;  %262 = vst.msk [vmem:[%s655_s1 + $0x20] sm:$0x2] %vm8_vm0, %v14_v33  }
  0x7e   :  { %265 = vst.msk [vmem:[%s655_s1 + $0x3] sm:$0x1] %vm8_vm0, %v30_v34   ;;  %266 = vst.msk [vmem:[%s655_s1 + $0x22] sm:$0x2] %vm8_vm0, %v30_v34  }
  0x80   :  { %v22_v35 = vpop.permute.xlu0 %21  }
  0x81   :  { %v38_v36 = vpop.permute.xlu1 %37   ;;  %263 = vst.msk [vmem:[%s655_s1 + $0x2] sm:$0x1] %vm8_vm0, %v22_v35   ;;  %264 = vst.msk [vmem:[%s655_s1 + $0x21] sm:$0x2] %vm8_vm0, %v22_v35  }
  0x82   :  { %267 = vst.msk [vmem:[%s655_s1 + $0x4] sm:$0x1] %vm8_vm0, %v38_v36   ;;  %268 = vst.msk [vmem:[%s655_s1 + $0x23] sm:$0x2] %vm8_vm0, %v38_v36  }
  0x84   :  { %v46_v37 = vpop.permute.xlu0 %45  }
  0x85   :  { %v54_v38 = vpop.permute.xlu1 %53   ;;  %269 = vst.msk [vmem:[%s655_s1 + $0x5] sm:$0x1] %vm8_vm0, %v46_v37   ;;  %270 = vst.msk [vmem:[%s655_s1 + $0x24] sm:$0x2] %vm8_vm0, %v46_v37  }
  0x86   :  { %271 = vst.msk [vmem:[%s655_s1 + $0x6] sm:$0x1] %vm8_vm0, %v54_v38   ;;  %272 = vst.msk [vmem:[%s655_s1 + $0x25] sm:$0x2] %vm8_vm0, %v54_v38  }
  0x88   :  { %v62_v39 = vpop.permute.xlu0 %61  }
  0x89   :  { %v70_v40 = vpop.permute.xlu1 %69   ;;  %273 = vst.msk [vmem:[%s655_s1 + $0x7] sm:$0x1] %vm8_vm0, %v62_v39   ;;  %274 = vst.msk [vmem:[%s655_s1 + $0x26] sm:$0x2] %vm8_vm0, %v62_v39  }
  0x8a   :  { %275 = vst.msk [vmem:[%s655_s1 + $0x8] sm:$0x1] %vm8_vm0, %v70_v40   ;;  %276 = vst.msk [vmem:[%s655_s1 + $0x27] sm:$0x2] %vm8_vm0, %v70_v40  }
  0x8c   :  { %v78_v41 = vpop.permute.xlu0 %77  }
  0x8d   :  { %v86_v42 = vpop.permute.xlu1 %85   ;;  %277 = vst.msk [vmem:[%s655_s1 + $0x9] sm:$0x1] %vm8_vm0, %v78_v41   ;;  %278 = vst.msk [vmem:[%s655_s1 + $0x28] sm:$0x2] %vm8_vm0, %v78_v41  }
  0x8e   :  { %279 = vst.msk [vmem:[%s655_s1 + $0xa] sm:$0x1] %vm8_vm0, %v86_v42   ;;  %280 = vst.msk [vmem:[%s655_s1 + $0x29] sm:$0x2] %vm8_vm0, %v86_v42  }
  0x90   :  { %v94_v43 = vpop.permute.xlu0 %93  }
  0x91   :  { %v102_v44 = vpop.permute.xlu1 %101   ;;  %281 = vst.msk [vmem:[%s655_s1 + $0xb] sm:$0x1] %vm8_vm0, %v94_v43   ;;  %282 = vst.msk [vmem:[%s655_s1 + $0x2a] sm:$0x2] %vm8_vm0, %v94_v43  }
  0x92   :  { %283 = vst.msk [vmem:[%s655_s1 + $0xc] sm:$0x1] %vm8_vm0, %v102_v44   ;;  %284 = vst.msk [vmem:[%s655_s1 + $0x2b] sm:$0x2] %vm8_vm0, %v102_v44  }
  0x94   :  { %v110_v45 = vpop.permute.xlu0 %109  }
  0x95   :  { %v118_v46 = vpop.permute.xlu1 %117   ;;  %285 = vst.msk [vmem:[%s655_s1 + $0xd] sm:$0x1] %vm8_vm0, %v110_v45   ;;  %286 = vst.msk [vmem:[%s655_s1 + $0x2c] sm:$0x2] %vm8_vm0, %v110_v45  }
  0x96   :  { %287 = vst.msk [vmem:[%s655_s1 + $0xe] sm:$0x1] %vm8_vm0, %v118_v46   ;;  %288 = vst.msk [vmem:[%s655_s1 + $0x2d] sm:$0x2] %vm8_vm0, %v118_v46  }
  0x98   :  { %v126_v47 = vpop.permute.xlu0 %125  }
  0x99   :  { %v134_v48 = vpop.permute.xlu1 %133   ;;  %289 = vst.msk [vmem:[%s655_s1 + $0xf] sm:$0x1] %vm8_vm0, %v126_v47   ;;  %290 = vst.msk [vmem:[%s655_s1 + $0x2e] sm:$0x2] %vm8_vm0, %v126_v47  }
  0x9a   :  { %291 = vst.msk [vmem:[%s655_s1 + $0x10] sm:$0x1] %vm8_vm0, %v134_v48   ;;  %292 = vst.msk [vmem:[%s655_s1 + $0x2f] sm:$0x2] %vm8_vm0, %v134_v48  }
  0x9c   :  { %v142_v49 = vpop.permute.xlu0 %141  }
  0x9d   :  { %v150_v50 = vpop.permute.xlu1 %149   ;;  %293 = vst.msk [vmem:[%s655_s1 + $0x11] sm:$0x1] %vm8_vm0, %v142_v49   ;;  %294 = vst.msk [vmem:[%s655_s1 + $0x30] sm:$0x2] %vm8_vm0, %v142_v49  }
  0x9e   :  { %295 = vst.msk [vmem:[%s655_s1 + $0x12] sm:$0x1] %vm8_vm0, %v150_v50   ;;  %296 = vst.msk [vmem:[%s655_s1 + $0x31] sm:$0x2] %vm8_vm0, %v150_v50  }
  0xa0   :  { %v158_v51 = vpop.permute.xlu0 %157  }
  0xa1   :  { %v166_v52 = vpop.permute.xlu1 %165   ;;  %297 = vst.msk [vmem:[%s655_s1 + $0x13] sm:$0x1] %vm8_vm0, %v158_v51   ;;  %298 = vst.msk [vmem:[%s655_s1 + $0x32] sm:$0x2] %vm8_vm0, %v158_v51  }
  0xa2   :  { %299 = vst.msk [vmem:[%s655_s1 + $0x14] sm:$0x1] %vm8_vm0, %v166_v52   ;;  %300 = vst.msk [vmem:[%s655_s1 + $0x33] sm:$0x2] %vm8_vm0, %v166_v52  }
  0xa4   :  { %v174_v53 = vpop.permute.xlu0 %173  }
  0xa5   :  { %v182_v54 = vpop.permute.xlu1 %181   ;;  %301 = vst.msk [vmem:[%s655_s1 + $0x15] sm:$0x1] %vm8_vm0, %v174_v53   ;;  %302 = vst.msk [vmem:[%s655_s1 + $0x34] sm:$0x2] %vm8_vm0, %v174_v53  }
  0xa6   :  { %303 = vst.msk [vmem:[%s655_s1 + $0x16] sm:$0x1] %vm8_vm0, %v182_v54   ;;  %304 = vst.msk [vmem:[%s655_s1 + $0x35] sm:$0x2] %vm8_vm0, %v182_v54  }
  0xa8   :  { %v190_v55 = vpop.permute.xlu0 %189  }
  0xa9   :  { %v198_v56 = vpop.permute.xlu1 %197   ;;  %305 = vst.msk [vmem:[%s655_s1 + $0x17] sm:$0x1] %vm8_vm0, %v190_v55   ;;  %306 = vst.msk [vmem:[%s655_s1 + $0x36] sm:$0x2] %vm8_vm0, %v190_v55  }
  0xaa   :  { %307 = vst.msk [vmem:[%s655_s1 + $0x18] sm:$0x1] %vm8_vm0, %v198_v56   ;;  %308 = vst.msk [vmem:[%s655_s1 + $0x37] sm:$0x2] %vm8_vm0, %v198_v56  }
  0xac   :  { %v206_v57 = vpop.permute.xlu0 %205  }
  0xad   :  { %v214_v58 = vpop.permute.xlu1 %213   ;;  %309 = vst.msk [vmem:[%s655_s1 + $0x19] sm:$0x1] %vm8_vm0, %v206_v57   ;;  %310 = vst.msk [vmem:[%s655_s1 + $0x38] sm:$0x2] %vm8_vm0, %v206_v57  }
  0xae   :  { %311 = vst.msk [vmem:[%s655_s1 + $0x1a] sm:$0x1] %vm8_vm0, %v214_v58   ;;  %312 = vst.msk [vmem:[%s655_s1 + $0x39] sm:$0x2] %vm8_vm0, %v214_v58  }
  0xb0   :  { %v222_v59 = vpop.permute.xlu0 %221  }
  0xb1   :  { %v230_v60 = vpop.permute.xlu1 %229   ;;  %313 = vst.msk [vmem:[%s655_s1 + $0x1b] sm:$0x1] %vm8_vm0, %v222_v59   ;;  %314 = vst.msk [vmem:[%s655_s1 + $0x3a] sm:$0x2] %vm8_vm0, %v222_v59  }
  0xb2   :  { %315 = vst.msk [vmem:[%s655_s1 + $0x1c] sm:$0x1] %vm8_vm0, %v230_v60   ;;  %316 = vst.msk [vmem:[%s655_s1 + $0x3b] sm:$0x2] %vm8_vm0, %v230_v60  }
  0xb4   :  { %v238_v61 = vpop.permute.xlu0 %237  }
  0xb5   :  { %v246_v62 = vpop.permute.xlu1 %245   ;;  %317 = vst.msk [vmem:[%s655_s1 + $0x1d] sm:$0x1] %vm8_vm0, %v238_v61   ;;  %318 = vst.msk [vmem:[%s655_s1 + $0x3c] sm:$0x2] %vm8_vm0, %v238_v61  }
  0xb6   :  { %319 = vst.msk [vmem:[%s655_s1 + $0x1e] sm:$0x1] %vm8_vm0, %v246_v62   ;;  %320 = vst.msk [vmem:[%s655_s1 + $0x3d] sm:$0x2] %vm8_vm0, %v246_v62  }
  0xb8   :  { %v254_v63 = vpop.permute.xlu0 %253  }
  0xb9   :  { %321 = vst.msk [vmem:[%s655_s1 + $0x1f] sm:$0x1] %vm8_vm0, %v254_v63   ;;  %322 = vst.msk [vmem:[%s655_s1 + $0x3e] sm:$0x2] %vm8_vm0, %v254_v63  }

// kernel: bilateral_block_l1_forward.4
= control target key start
LH: loop header
LB: loop body
LE: loop exit
PB: predicated region body
PF: predicated region fallthrough
CT: control target
= control target key end

     0   :  { %s683_s15 = smov 0   ;;  %s685_s16 = smov 0   ;;  %s734_s0 = inlined_call_operand.vmem [shape: f32[2,8,16], index: 0, kind: input, shape index: {}, may-alias: {0,1}]   ;;  %s735_s1 = inlined_call_operand.vmem [shape: f32[2,8,16], index: 1, kind: input, shape index: {}, may-alias: {0,1}]   ;;  %s736_s2 = inlined_call_operand.vmem [shape: f32[2,16,1], index: 2, kind: input, shape index: {}]   ;;  %s737_s3 = inlined_call_operand.vmem [shape: f32[2,1,16], index: 3, kind: input, shape index: {}]   ;;  %s738_s4 = inlined_call_operand.vmem [shape: f32[2,16,16], index: 4, kind: output, shape index: {}]  }
   0x1   :  { %s687_s17 = smov 0  }
   0x2 LB: > { %s26_s18 = sadd.s32 1, %s651_s16  ;;  %p583_p0 = scmp.ge.s32.totalorder %s655_s17, 1  ;;  %s655_s17 = sphi %s687_s17, %s14_s17   ;;  %s651_s16 = sphi %s685_s16, %s740_s16   ;;  %s647_s15 = sphi %s683_s15, %s739_s15  }
   0x3   : > { %p28_p1 = scmp.ge.s32.totalorder %s26_s18, 2  ;;  %p214_p2 = scmp.lt.s32.totalorder %s655_s17, 3 }
   0x5   : > { %s742_s18 = smov (%p28_p1, %s26_s18), 0  ;;  %p215_p3 = pnand %p583_p0, %p214_p2 }
   0x6   : > { %p262_p4 = scmp.lt.s32.totalorder (!%p215_p3), %s647_s15, 1 }
   0x7   : > { %218 = sbr.rel (%p215_p3) target bundleno = 348 (0x15c), region = 36 }
   0xc   : > { %s744_s15 = smov (!%p262_p4, %s647_s15), 1  ;;  %v657_v2 = vmov 0   ;;  %vm330_vm0 = vcmask 64512   ;;  %v437_v7 = vlaneseq  ;;  %vm453_vm5 = vcmask 130048  }
   0xd   : > { %s584_s19 = sshll.u32 %s744_s15, 3  ;;  %s595_s26 = sshll.u32 %s744_s15, 4  ;;  %632 = vset.pattern.permute.xlu1 %v657_v2 }
   0xe   : > { %s268_s22 = scalar_lea.vmem %s734_s0, %s584_s19  ;;  %s272_s25 = scalar_lea.vmem %s735_s1, %s584_s19  ;;  %v438_v8 = vshrl.u32 %v437_v7, 7  ;;  %v445_v10 = vand.u32 127, %v437_v7 }
   0xf   : > { %v296_v0 = vld [vmem:[%s268_s22] sm:$0xff]  ;;  %s281_s29 = scalar_lea.vmem %s736_s2, %s595_s26  ;;  %s285_s6 = scalar_lea.vmem %s737_s3, %s744_s15 }
  0x10   : > { %v297_v1 = vld [vmem:[%s272_s25] sm:$0xff]  ;;  %298 = vxpose.xlu0.b32.start.end [1/1] (short) (narrow) %v296_v0, 16  ;;  %v415_v3 = vld [vmem:[%s281_s29 + $0x8] sm:$0xff]  ;;  %v439_v9 = vadd.s32 8, %v438_v8  ;;  %vm448_vm2 = vcmp.ge.s32.totalorder %v445_v10, 16  ;;  %vm446_vm3 = vcmp.eq.s32.totalorder %v438_v8, %v445_v10  ;;  %s294_s9 = scalar_lea.vmem %s738_s4, %s595_s26 }
  0x11   : > { %600 = vmatprep.subr.mxu0 %v297_v1  ;;  %423 = vperm.xlu1 %632, %v415_v3   ;;  %v414_v4 = vld [vmem:[%s281_s29] sm:$0xff]  ;;  %vm449_vm6 = vmor %vm446_vm3, %vm448_vm2 }
  0x12   : > { %601 = vmatpush3.msra.mxu0 %v297_v1  ;;  %vm447_vm1 = vcmp.eq.s32.totalorder %v439_v9, %v445_v10  ;;  %v592_v14 = vld [vmem:[%s285_s6] ss:$0 sm:$0xff] }
  0x13   : > { %vm450_vm4 = vmor %vm447_vm1, %vm448_vm2 }
  0x39   : > { %631 = vset.pattern.permute.xlu0 %v657_v2 }
  0x3d   : > { %418 = vperm.xlu0 %631, %v414_v4  }
  0x8c   : > { %v314_v5 = vpop.trf.xlu0  ;;  %v424_v12 = vpop.permute.xlu1 %423 }
  0x8d   : > { %602 = vmatprep.mubr.msk.f32.mxu0 %vm330_vm0, %v314_v5 }
  0x90   : > { %v315_v6 = vpop.trf.xlu0 }
  0x91   : > { %603 = vmatmul.mubr.msk.f32.vlgmr.msra.gmra.mxu0 %vm330_vm0, %v315_v6 }
  0xb8   : > { %v419_v16 = vpop.permute.xlu0 %418 }
 0x151   : > { %v604_v11 = vpop.f32.mrf.mxu0 }
 0x152   : > { %v413_v13 = vmul.f32 2.0, %v604_v11 }
 0x153   : > { %v403_v15 = vpop.f32.mrf.mxu0 }
 0x154   : > { %v427_v17 = vsub.f32 %v413_v13, %v424_v12  ;;  %v412_v18 = vmul.f32 2.0, %v403_v15 }
 0x156   : > { %v436_v19 = vsub.f32 %v427_v17, %v592_v14  ;;  %v426_v20 = vsub.f32 %v412_v18, %v419_v16 }
 0x158   : > { %v452_v21 = vsel %vm450_vm4, -1e+30, %v436_v19  ;;  %v435_v22 = vsub.f32 %v426_v20, %v592_v14 }
 0x159   : > { %455 = vst.msk [vmem:[%s294_s9 + $0x8] sm:$0xff] %vm453_vm5, %v452_v21 }
 0x15a   : > { %v451_v23 = vsel %vm449_vm6, -1e+30, %v435_v22 }
 0x15b   : > { %454 = vst.msk [vmem:[%s294_s9] sm:$0xff] %vm453_vm5, %v451_v23 }
 0x15c PF: > { %s14_s17 = sadd.s32 1, %s655_s17   ;;  %s739_s15 = smov %s651_s16 }
 0x15d   : > { %p11_p5 = scmp.ge.s32.totalorder %s14_s17, 4   ;;  %s740_s16 = smov %s742_s18 }
 0x15f   :  { %13 = sbr.rel (!%p11_p5) target bundleno = 2 (0x2), region = 75 }

// kernel: bilateral_block_l1_forward.5
= control target key start
LH: loop header
LB: loop body
LE: loop exit
PB: predicated region body
PF: predicated region fallthrough
CT: control target
= control target key end

     0   :  { %s1074_s24 = smov 0   ;;  %s1076_s25 = smov 0   ;;  %s1249_s0 = inlined_call_operand.vmem [shape: f32[2,64,16], index: 0, kind: input, shape index: {}]   ;;  %s1250_s1 = inlined_call_operand.vmem [shape: f32[96,64], index: 1, kind: input, shape index: {}]   ;;  %s1251_s2 = inlined_call_operand.vmem [shape: f32[64,1], index: 2, kind: input, shape index: {}]   ;;  %s1252_s3 = inlined_call_operand.vmem [shape: f32[32,64], index: 3, kind: input, shape index: {}]   ;;  %s1253_s4 = inlined_call_operand.vmem [shape: f32[32,1], index: 4, kind: input, shape index: {}]   ;;  %s1254_s5 = inlined_call_operand.vmem [shape: f32[32,1], index: 5, kind: input, shape index: {}]   ;;  %s1255_s6 = inlined_call_operand.vmem [shape: f32[32,1], index: 6, kind: input, shape index: {}]   ;;  %s1256_s7 = inlined_call_operand.vmem [shape: f32[2,32,16], index: 7, kind: output, shape index: {}]  }
   0x1   :  { %s1078_s26 = smov 0  }
   0x2 LB: > { %s29_s27 = sadd.s32 1, %s1027_s25  ;;  %p869_p0 = scmp.ge.s32.totalorder %s1031_s26, 1  ;;  %s1031_s26 = sphi %s1078_s26, %s17_s26   ;;  %s1027_s25 = sphi %s1076_s25, %s1258_s25   ;;  %s1023_s24 = sphi %s1074_s24, %s1257_s24  }
   0x3   : > { %p31_p1 = scmp.ge.s32.totalorder %s29_s27, 2  ;;  %p256_p2 = scmp.lt.s32.totalorder %s1031_s26, 3 }
   0x5   : > { %s1260_s27 = smov (%p31_p1, %s29_s27), 0  ;;  %p257_p3 = pnand %p869_p0, %p256_p2 }
   0x6   : > { %p294_p4 = scmp.lt.s32.totalorder (!%p257_p3), %s1023_s24, 1 }
   0x7   : > { %260 = sbr.rel (%p257_p3) target bundleno = 472 (0x1d8), region = 48 }
   0xc   : > { %v318_v0 = vld [vmem:[%s1250_s1] sm:$0xff]  ;;  %vm330_vm0 = vcmask 523264   ;;  %v1033_v1 = vmov 0   ;;  %s1262_s24 = smov (!%p294_p4, %s1023_s24), 1  ;;  %v499_v2 = vld [vmem:[%s1251_s2 + $0x38] sm:$0xff]  ;;  %v497_v3 = vld [vmem:[%s1251_s2 + $0x28] sm:$0xff] }
   0xd   : > { %942 = vmatprep.mubr.msk.f32.mxu0 %vm330_vm0, %v318_v0  ;;  %1007 = vset.pattern.permute.xlu0 %v1033_v1  ;;  %s892_s11 = sshll.u32 %s1262_s24, 6  ;;  %v498_v4 = vld [vmem:[%s1251_s2 + $0x30] sm:$0xff]  ;;  %v496_v5 = vld [vmem:[%s1251_s2 + $0x20] sm:$0xff]  ;;  %v495_v9 = vld [vmem:[%s1251_s2 + $0x18] sm:$0xff]  ;;  %s893_s28 = sshll.u32 %s1262_s24, 5  ;;  %vm777_vm9 = vcmask 130048  }
   0xe   : > { %1008 = vset.pattern.permute.xlu1 %v1033_v1  ;;  %537 = vperm.xlu0 %1007, %v499_v2   ;;  %s1111_s16 = scalar_lea.vmem %s1249_s0, %s892_s11  ;;  %v494_v10 = vld [vmem:[%s1251_s2 + $0x10] sm:$0xff]  ;;  %v493_v13 = vld [vmem:[%s1251_s2 + $0x8] sm:$0xff]  ;;  %v492_v14 = vld [vmem:[%s1251_s2] sm:$0xff]  ;;  %s309_s8 = scalar_lea.vmem %s1256_s7, %s893_s28 }
   0xf   : > { %527 = vperm.xlu1 %1008, %v497_v3   ;;  %v317_v6 = vld [vmem:[%s1111_s16 + $0x38] sm:$0xff]  ;;  %v316_v7 = vld [vmem:[%s1111_s16 + $0x30] sm:$0xff]  ;;  %v315_v8 = vld [vmem:[%s1111_s16 + $0x28] sm:$0xff] }
  0x10   : > { %926 = vmatprep.subr.mxu0 %v317_v6  ;;  %v314_v11 = vld [vmem:[%s1111_s16 + $0x20] sm:$0xff]  ;;  %v313_v12 = vld [vmem:[%s1111_s16 + $0x18] sm:$0xff]  ;;  %v312_v15 = vld [vmem:[%s1111_s16 + $0x10] sm:$0xff] }
  0x11   : > { %927 = vmatpush3.msra.mxu0 %v317_v6  ;;  %v311_v16 = vld [vmem:[%s1111_s16 + $0x8] sm:$0xff]  ;;  %v677_v17 = vld [vmem:[%s1253_s4] sm:$0xff]  ;;  %v679_v21 = vld [vmem:[%s1253_s4 + $0x10] sm:$0xff] }
  0x12   : > { %532 = vperm.xlu0 %1007, %v498_v4   ;;  %928 = vmatprep.subr.mxu0 %v316_v7  ;;  %v678_v18 = vld [vmem:[%s1253_s4 + $0x8] sm:$0xff]  ;;  %v310_v19 = vld [vmem:[%s1111_s16] sm:$0xff]  ;;  %v320_v22 = vld [vmem:[%s1250_s1 + $0x10] sm:$0xff] }
  0x13   : > { %522 = vperm.xlu1 %1008, %v496_v5   ;;  %929 = vmatpush3.msra.mxu0 %v316_v7  ;;  %v319_v20 = vld [vmem:[%s1250_s1 + $0x8] sm:$0xff]  ;;  %v680_v23 = vld [vmem:[%s1253_s4 + $0x18] sm:$0xff]  ;;  %v709_v25 = vld [vmem:[%s1254_s5] sm:$0xff] }
  0x14   : > { %930 = vmatprep.subr.mxu0 %v315_v8  ;;  %v321_v24 = vld [vmem:[%s1250_s1 + $0x18] sm:$0xff]  ;;  %v322_v26 = vld [vmem:[%s1250_s1 + $0x20] sm:$0xff]  ;;  %v710_v27 = vld [vmem:[%s1254_s5 + $0x8] sm:$0xff] }
  0x15   : > { %931 = vmatpush3.msra.mxu0 %v315_v8  ;;  %v323_v28 = vld [vmem:[%s1250_s1 + $0x28] sm:$0xff]  ;;  %v711_v29 = vld [vmem:[%s1254_s5 + $0x10] sm:$0xff]  ;;  %v712_v31 = vld [vmem:[%s1254_s5 + $0x18] sm:$0xff] }
  0x16   : > { %517 = vperm.xlu0 %1007, %v495_v9   ;;  %932 = vmatprep.subr.mxu0 %v314_v11  ;;  %v324_v30 = vld [vmem:[%s1250_s1 + $0x30] sm:$0xff]  ;;  %v325_v32 = vld [vmem:[%s1250_s1 + $0x38] sm:$0xff]  ;;  %v737_v33 = vld [vmem:[%s1255_s6] sm:$0xff] }
  0x17   : > { %512 = vperm.xlu1 %1008, %v494_v10   ;;  %933 = vmatpush3.msra.mxu0 %v314_v11  ;;  %v738_v34 = vld [vmem:[%s1255_s6 + $0x8] sm:$0xff]  ;;  %v739_v35 = vld [vmem:[%s1255_s6 + $0x10] sm:$0xff]  ;;  %v740_v36 = vld [vmem:[%s1255_s6 + $0x18] sm:$0xff] }
  0x18   : > { %934 = vmatprep.subr.mxu0 %v313_v12  ;;  %v326_v37 = vld [vmem:[%s1250_s1 + $0x40] sm:$0xff]  ;;  %v327_v38 = vld [vmem:[%s1250_s1 + $0x48] sm:$0xff]  ;;  %v328_v40 = vld [vmem:[%s1250_s1 + $0x50] sm:$0xff] }
  0x19   : > { %935 = vmatpush3.msra.mxu0 %v313_v12  ;;  %v572_v39 = vld [vmem:[%s1252_s3] sm:$0xff]  ;;  %v329_v41 = vld [vmem:[%s1250_s1 + $0x58] sm:$0xff] }
  0x1a   : > { %507 = vperm.xlu0 %1007, %v493_v13   ;;  %936 = vmatprep.subr.mxu0 %v312_v15 }
  0x1b   : > { %502 = vperm.xlu1 %1008, %v492_v14   ;;  %937 = vmatpush3.msra.mxu0 %v312_v15 }
  0x1c   : > { %938 = vmatprep.subr.mxu0 %v311_v16  ;;  %976 = vmatprep.mubr.msk.f32.mxu1 %vm330_vm0, %v572_v39 }
  0x1d   : > { %939 = vmatpush3.msra.mxu0 %v311_v16 }
  0x1e   : > { %683 = vperm.xlu0 %1007, %v677_v17   ;;  %940 = vmatprep.subr.mxu0 %v310_v19 }
  0x1f   : > { %688 = vperm.xlu1 %1008, %v678_v18   ;;  %941 = vmatpush3.msra.mxu0 %v310_v19  ;;  %v573_v18 = vld [vmem:[%s1252_s3 + $0x8] sm:$0xff]  ;;  %v574_v19 = vld [vmem:[%s1252_s3 + $0x10] sm:$0xff] }
  0x20   : > { %943 = vmatmul.mubr.msk.f32.vlgmr.msra.gmra.mxu0 %vm330_vm0, %v319_v20  ;;  %v575_v20 = vld [vmem:[%s1252_s3 + $0x18] sm:$0xff] }
  0x21   : > { %945 = vmatprep.mubr.msk.f32.mxu0 %vm330_vm0, %v320_v22 }
  0x22   : > { %693 = vperm.xlu0 %1007, %v679_v21  }
  0x23   : > { %698 = vperm.xlu1 %1008, %v680_v23  }
  0x24   : > { %946 = vmatmul.mubr.msk.f32.gmra.mxu0 %vm330_vm0, %v321_v24 }
  0x25   : > { %948 = vmatprep.mubr.msk.f32.mxu0 %vm330_vm0, %v322_v26 }
  0x26   : > { %715 = vperm.xlu0 %1007, %v709_v25  }
  0x27   : > { %720 = vperm.xlu1 %1008, %v710_v27  }
  0x28   : > { %949 = vmatmul.mubr.msk.f32.gmra.mxu0 %vm330_vm0, %v323_v28 }
  0x29   : > { %951 = vmatprep.mubr.msk.f32.mxu0 %vm330_vm0, %v324_v30 }
  0x2a   : > { %725 = vperm.xlu0 %1007, %v711_v29  }
  0x2b   : > { %730 = vperm.xlu1 %1008, %v712_v31  }
  0x2c   : > { %952 = vmatmul.mubr.msk.f32.gmra.mxu0 %vm330_vm0, %v325_v32 }
  0x2d   : > { %954 = vmatprep.mubr.msk.f32.mxu0 %vm330_vm0, %v326_v37 }
  0x2e   : > { %743 = vperm.xlu0 %1007, %v737_v33  }
  0x2f   : > { %748 = vperm.xlu1 %1008, %v738_v34  }
  0x30   : > { %955 = vmatmul.mubr.msk.f32.gmra.mxu0 %vm330_vm0, %v327_v38 }
  0x31   : > { %957 = vmatprep.mubr.msk.f32.mxu0 %vm330_vm0, %v328_v40 }
  0x32   : > { %753 = vperm.xlu0 %1007, %v739_v35  }
  0x33   : > { %758 = vperm.xlu1 %1008, %v740_v36  }
  0x34   : > { %958 = vmatmul.mubr.msk.f32.gmra.mxu0 %vm330_vm0, %v329_v41 }
  0x89   : > { %v538_v43 = vpop.permute.xlu0 %537 }
  0x8a   : > { %v528_v45 = vpop.permute.xlu1 %527 }
  0x8d   : > { %v533_v48 = vpop.permute.xlu0 %532 }
  0x8e   : > { %v523_v50 = vpop.permute.xlu1 %522 }
  0x91   : > { %v518_v55 = vpop.permute.xlu0 %517 }
  0x92   : > { %v513_v60 = vpop.permute.xlu1 %512 }
  0x95   : > { %v508_v4 = vpop.permute.xlu0 %507 }
  0x96   : > { %v503_v8 = vpop.permute.xlu1 %502 }
  0x99   : > { %v684_v22 = vpop.permute.xlu0 %683 }
  0x9a   : > { %v689_v21 = vpop.permute.xlu1 %688 }
  0x9d   : > { %v694_v24 = vpop.permute.xlu0 %693 }
  0x9e   : > { %v699_v23 = vpop.permute.xlu1 %698 }
  0xa1   : > { %v716_v27 = vpop.permute.xlu0 %715 }
  0xa2   : > { %v721_v25 = vpop.permute.xlu1 %720 }
  0xa5   : > { %v726_v34 = vpop.permute.xlu0 %725 }
  0xa6   : > { %v731_v29 = vpop.permute.xlu1 %730 }
  0xaa   : > { %v749_v38 = vpop.permute.xlu1 %748 }
  0xe0   : > { %v944_v42 = vpop.f32.mrf.mxu0 }
  0xe1   : > { %v541_v5 = vadd.f32 %v944_v42, %v508_v4 }
  0xe2   : > { %v433_v44 = vpop.f32.mrf.mxu0 }
  0xe3   : > { %v540_v9 = vadd.f32 %v503_v8, %v433_v44  ;;  %v557_v12 = vmul.f32 0.01, %v541_v5  ;;  %vm549_vm7 = vcmp.ge.f32.partialorder %v541_v5, 0.0 }
  0xe4   : > { %v947_v46 = vpop.f32.mrf.mxu0 }
  0xe5   : > { %v543_v61 = vadd.f32 %v947_v46, %v518_v55  ;;  %v556_v14 = vmul.f32 0.01, %v540_v9  ;;  %vm548_vm8 = vcmp.ge.f32.partialorder %v540_v9, 0.0  ;;  %v565_v16 = vsel %vm549_vm7, %v541_v5, %v557_v12 }
  0xe6   : > { %v443_v47 = vpop.f32.mrf.mxu0 }
  0xe7   : > { %v542_v1 = vadd.f32 %v513_v60, %v443_v47  ;;  %v559_v6 = vmul.f32 0.01, %v543_v61  ;;  %vm551_vm5 = vcmp.ge.f32.partialorder %v543_v61, 0.0  ;;  %v564_v17 = vsel %vm548_vm8, %v540_v9, %v556_v14 }
  0xe8   : > { %v950_v49 = vpop.f32.mrf.mxu0 }
  0xe9   : > { %v545_v53 = vadd.f32 %v950_v49, %v528_v45  ;;  %v558_v10 = vmul.f32 0.01, %v542_v1  ;;  %vm550_vm6 = vcmp.ge.f32.partialorder %v542_v1, 0.0  ;;  %v567_v13 = vsel %vm551_vm5, %v543_v61, %v559_v6 }
  0xea   : > { %v453_v51 = vpop.f32.mrf.mxu0 }
  0xeb   : > { %v544_v57 = vadd.f32 %v523_v50, %v453_v51  ;;  %v561_v62 = vmul.f32 0.01, %v545_v53  ;;  %vm553_vm3 = vcmp.ge.f32.partialorder %v545_v53, 0.0  ;;  %v566_v15 = vsel %vm550_vm6, %v542_v1, %v558_v10 }
  0xec   : > { %v953_v52 = vpop.f32.mrf.mxu0 }
  0xed   : > { %v547_v54 = vadd.f32 %v953_v52, %v538_v43  ;;  %v560_v2 = vmul.f32 0.01, %v544_v57  ;;  %vm552_vm4 = vcmp.ge.f32.partialorder %v544_v57, 0.0  ;;  %v569_v7 = vsel %vm553_vm3, %v545_v53, %v561_v62 }
  0xee   : > { %v463_v56 = vpop.f32.mrf.mxu0 }
  0xef   : > { %v546_v58 = vadd.f32 %v533_v48, %v463_v56  ;;  %vm555_vm1 = vcmp.ge.f32.partialorder %v547_v54, 0.0  ;;  %v563_v59 = vmul.f32 0.01, %v547_v54  ;;  %v568_v11 = vsel %vm552_vm4, %v544_v57, %v560_v2  ;;  %v744_v48 = vpop.permute.xlu0 %743  ;;  %v759_v56 = vpop.permute.xlu1 %758 }
  0xf0   : > { %v956_v26 = vpop.f32.mrf.mxu0 }
  0xf1   : > { %v562_v63 = vmul.f32 0.01, %v546_v58  ;;  %v571_v0 = vsel %vm555_vm1, %v547_v54, %v563_v59  ;;  %vm554_vm2 = vcmp.ge.f32.partialorder %v546_v58, 0.0 }
  0xf2   : > { %960 = vmatprep.subr.mxu1 %v571_v0  ;;  %v473_v28 = vpop.f32.mrf.mxu0 }
  0xf3   : > { %961 = vmatpush3.msra.mxu1 %v571_v0  ;;  %v570_v3 = vsel %vm554_vm2, %v546_v58, %v562_v63  ;;  %v754_v62 = vpop.permute.xlu0 %753 }
  0xf4   : > { %962 = vmatprep.subr.mxu1 %v570_v3  ;;  %v959_v32 = vpop.f32.mrf.mxu0 }
  0xf5   : > { %963 = vmatpush3.msra.mxu1 %v570_v3 }
  0xf6   : > { %964 = vmatprep.subr.mxu1 %v569_v7  ;;  %v483_v42 = vpop.f32.mrf.mxu0 }
  0xf7   : > { %965 = vmatpush3.msra.mxu1 %v569_v7 }
  0xf8   : > { %966 = vmatprep.subr.mxu1 %v568_v11 }
  0xf9   : > { %967 = vmatpush3.msra.mxu1 %v568_v11 }
  0xfa   : > { %968 = vmatprep.subr.mxu1 %v567_v13 }
  0xfb   : > { %969 = vmatpush3.msra.mxu1 %v567_v13 }
  0xfc   : > { %970 = vmatprep.subr.mxu1 %v566_v15 }
  0xfd   : > { %971 = vmatpush3.msra.mxu1 %v566_v15 }
  0xfe   : > { %972 = vmatprep.subr.mxu1 %v565_v16 }
  0xff   : > { %973 = vmatpush3.msra.mxu1 %v565_v16 }
 0x100   : > { %974 = vmatprep.subr.mxu1 %v564_v17 }
 0x101   : > { %975 = vmatpush3.msra.mxu1 %v564_v17 }
 0x102   : > { %977 = vmatmul.mubr.msk.f32.vlgmr.msra.gmra.mxu1 %vm330_vm0, %v573_v18 }
 0x103   : > { %979 = vmatprep.mubr.msk.f32.mxu1 %vm330_vm0, %v574_v19 }
 0x106   : > { %980 = vmatmul.mubr.msk.f32.gmra.mxu1 %vm330_vm0, %v575_v20 }
 0x1c2   : > { %v978_v30 = vpop.f32.mrf.mxu1 }
 0x1c3   : > { %v674_v31 = vadd.f32 %v978_v30, %v956_v26 }
 0x1c4   : > { %v654_v33 = vpop.f32.mrf.mxu1 }
 0x1c5   : > { %v702_v35 = vadd.f32 %v689_v21, %v674_v31  ;;  %v673_v36 = vadd.f32 %v654_v33, %v473_v28 }
 0x1c6   : > { %v981_v37 = vpop.f32.mrf.mxu1 }
 0x1c7   : > { %v706_v39 = vmax.f32 %v702_v35, 0.0  ;;  %v701_v40 = vadd.f32 %v684_v22, %v673_v36  ;;  %v676_v41 = vadd.f32 %v981_v37, %v959_v32 }
 0x1c8   : > { %v664_v43 = vpop.f32.mrf.mxu1 }
 0x1c9   : > { %v734_v44 = vmul.f32 %v721_v25, %v706_v39  ;;  %v705_v45 = vmax.f32 %v701_v40, 0.0  ;;  %v704_v46 = vadd.f32 %v699_v23, %v676_v41  ;;  %v675_v47 = vadd.f32 %v664_v43, %v483_v42 }
 0x1cb   : > { %v762_v49 = vadd.f32 %v749_v38, %v734_v44  ;;  %v733_v50 = vmul.f32 %v716_v27, %v705_v45  ;;  %v708_v51 = vmax.f32 %v704_v46, 0.0  ;;  %v703_v52 = vadd.f32 %v694_v24, %v675_v47 }
 0x1cd   : > { %vm766_vm10 = vcmp.ge.f32.partialorder %v762_v49, 0.0  ;;  %v770_v53 = vmul.f32 0.01, %v762_v49  ;;  %v761_v54 = vadd.f32 %v744_v48, %v733_v50  ;;  %v736_v55 = vmul.f32 %v731_v29, %v708_v51 }
 0x1ce   : > { %v707_v57 = vmax.f32 %v703_v52, 0.0 }
 0x1cf   : > { %v774_v58 = vsel %vm766_vm10, %v762_v49, %v770_v53  ;;  %vm765_vm11 = vcmp.ge.f32.partialorder %v761_v54, 0.0  ;;  %v769_v59 = vmul.f32 0.01, %v761_v54  ;;  %v764_v60 = vadd.f32 %v759_v56, %v736_v55 }
 0x1d0   : > { %779 = vst.msk [vmem:[%s309_s8 + $0x8] sm:$0xff] %vm777_vm9, %v774_v58  ;;  %v735_v61 = vmul.f32 %v726_v34, %v707_v57 }
 0x1d1   : > { %v773_v63 = vsel %vm765_vm11, %v761_v54, %v769_v59  ;;  %vm768_vm12 = vcmp.ge.f32.partialorder %v764_v60, 0.0  ;;  %v772_v0 = vmul.f32 0.01, %v764_v60 }
 0x1d2   : > { %778 = vst.msk [vmem:[%s309_s8] sm:$0xff] %vm777_vm9, %v773_v63  ;;  %v763_v1 = vadd.f32 %v754_v62, %v735_v61 }
 0x1d3   : > { %v776_v2 = vsel %vm768_vm12, %v764_v60, %v772_v0 }
 0x1d4   : > { %781 = vst.msk [vmem:[%s309_s8 + $0x18] sm:$0xff] %vm777_vm9, %v776_v2  ;;  %vm767_vm13 = vcmp.ge.f32.partialorder %v763_v1, 0.0  ;;  %v771_v3 = vmul.f32 0.01, %v763_v1 }
 0x1d6   : > { %v775_v4 = vsel %vm767_vm13, %v763_v1, %v771_v3 }
 0x1d7   : > { %780 = vst.msk [vmem:[%s309_s8 + $0x10] sm:$0xff] %vm777_vm9, %v775_v4 }
 0x1d8 PF: > { %s17_s26 = sadd.s32 1, %s1031_s26   ;;  %s1257_s24 = smov %s1027_s25 }
 0x1d9   : > { %p14_p5 = scmp.ge.s32.totalorder %s17_s26, 4   ;;  %s1258_s25 = smov %s1260_s27 }
 0x1db   :  { %16 = sbr.rel (!%p14_p5) target bundleno = 2 (0x2), region = 78 }

// kernel: bilateral_block_l1_forward.3
= control target key start
LH: loop header
LB: loop body
LE: loop exit
PB: predicated region body
PF: predicated region fallthrough
CT: control target
= control target key end

     0   :  { %vm39_vm0 = vcmask 64512   ;;  %v501_v0 = vmov 0.0   ;;  %vm502_vm1 = vmmov 0   ;;  %vm233_vm4 = vcmask 130048   ;;  %s623_s1 = inlined_call_operand.vmem [shape: f32[8,8], index: 1, kind: input, shape index: {}]   ;;  %s624_s0 = inlined_call_operand.vmem [shape: f32[2,8], index: 0, kind: input, shape index: {}]   ;;  %s625_s4 = inlined_call_operand.vmem [shape: f32[8,16], index: 4, kind: input, shape index: {}]   ;;  %s626_s2 = inlined_call_operand.vmem [shape: f32[1,8], index: 2, kind: input, shape index: {}]   ;;  %s627_s3 = inlined_call_operand.vmem [shape: f32[1,8], index: 3, kind: input, shape index: {}]   ;;  %s628_s7 = inlined_call_operand.vmem [shape: f32[16,512], index: 7, kind: input, shape index: {}]   ;;  %s629_s5 = inlined_call_operand.vmem [shape: f32[1,16], index: 5, kind: input, shape index: {}]   ;;  %s630_s6 = inlined_call_operand.vmem [shape: f32[1,16], index: 6, kind: input, shape index: {}]   ;;  %s631_s10 = inlined_call_operand.vmem [shape: f32[2,16], index: 10, kind: output, shape index: {0}]   ;;  %s632_s8 = inlined_call_operand.vmem [shape: f32[1,512], index: 8, kind: input, shape index: {}]   ;;  %s633_s9 = inlined_call_operand.vmem [shape: f32[1,512], index: 9, kind: input, shape index: {}]   ;;  %s634_s11 = inlined_call_operand.vmem [shape: f32[2,512], index: 11, kind: output, shape index: {1}]  }
   0x1   :  { %488 = vmatprep.subr.mxu0 %v501_v0  ;;  %v38_v1 = vld [vmem:[%s623_s1] sm:$0xff]  ;;  %490 = vmatprep.mubr.msk.f32.mxu0 %vm502_vm1, %v501_v0  ;;  %v230_v12 = vld [vmem:[%s628_s7 + $0x28] sm:$0xff]  ;;  %v232_v13 = vld [vmem:[%s628_s7 + $0x38] sm:$0xff]  ;;  %vm443_vm5 = vcmask 123904   ;;  %v381_v28 = vlaneseq  ;;  %v503_v46 = vmov 1983009808  }
   0x2   :  { %v37_v2 = vld [vmem:[%s624_s0] sm:$0x3]  ;;  %489 = vmatpush3.msra.mxu0 %v38_v1  ;;  %493 = vmatprep.subr.mxu1 %v501_v0  ;;  %v231_v15 = vld [vmem:[%s628_s7 + $0x30] sm:$0xff]  ;;  %v226_v16 = vld [vmem:[%s628_s7 + $0x8] sm:$0xff]  ;;  %v452_v47 = vunpack.c.l.s4 %v503_v46 }
   0x3   :  { %491 = vmatmul.mubr.msk.f32.vlgmr.msra.gmra.mxu0 %vm39_vm0, %v37_v2  ;;  %495 = vmatprep.mubr.msk.f32.mxu1 %vm502_vm1, %v501_v0  ;;  %v132_v3 = vld [vmem:[%s625_s4] sm:$0xff]  ;;  %v228_v17 = vld [vmem:[%s628_s7 + $0x18] sm:$0xff]  ;;  %v227_v19 = vld [vmem:[%s628_s7 + $0x10] sm:$0xff]  ;;  %v382_v29 = vshrl.u32 %v381_v28, 7 }
   0x4   :  { %301 = vmatprep.mubr.f32.mxu0 %v501_v0  ;;  %494 = vmatpush3.msra.mxu1 %v132_v3  ;;  %v477_v4 = vld [vmem:[%s626_s2] ss:$0 sm:$0xff]  ;;  %v453_v56 = vunpack.c.0.s8 %v452_v47 }
   0x5   :  { %v478_v6 = vld [vmem:[%s627_s3] ss:$0 sm:$0xff]  ;;  %265 = vmatprep.subr.mxu0 %v230_v12  ;;  %336 = vmatprep.subr.mxu1 %v232_v13  ;;  %v383_v30 = vsub.s32 0, %v382_v29  ;;  %v391_v31 = vsub.s32 2, %v382_v29  ;;  %v387_v33 = vsub.s32 1, %v382_v29  ;;  %v395_v34 = vsub.s32 3, %v382_v29 }
   0x6   :  { %v229_v14 = vld [vmem:[%s628_s7 + $0x20] sm:$0xff]  ;;  %v456_v63 = vsub.s32 %v453_v56, %v382_v29 }
   0x7   :  { %266 = vmatpush1.msra.mxu0 %v229_v14  ;;  %v225_v18 = vld [vmem:[%s628_s7] sm:$0xff] }
   0x8   :  { %267 = vmatprep.subr.mxu0 %v226_v16  ;;  %v480_v20 = vld [vmem:[%s629_s5] ss:$0 sm:$0xff] }
   0x9   :  { %268 = vmatpush1.msra.mxu0 %v225_v18  ;;  %v481_v22 = vld [vmem:[%s630_s6] ss:$0 sm:$0xff] }
   0xa   :  { %v379_v32 = vld [vmem:[%s632_s8] sm:$0xf] }
   0xb   :  { %v405_v35 = vld [vmem:[%s633_s9] sm:$0xf]  ;;  %v384_v36 = vrot.slane %v379_v32, %v383_v30  ;;  %v392_v37 = vrot.slane %v379_v32, %v391_v31  ;;  %v388_v40 = vrot.slane %v379_v32, %v387_v33  ;;  %v396_v41 = vrot.slane %v379_v32, %v395_v34 }
   0xc   :  { %v410_v38 = vrot.slane %v405_v35, %v383_v30  ;;  %v418_v39 = vrot.slane %v405_v35, %v391_v31  ;;  %v414_v49 = vrot.slane %v405_v35, %v387_v33  ;;  %v422_v51 = vrot.slane %v405_v35, %v395_v34 }
  0xc3   :  { %v109_v5 = vpop.f32.mrf.mxu0 }
  0xc4   :  { %v120_v7 = vmul.f32 %v477_v4, %v109_v5 }
  0xc5   :  { %v492_v8 = vpop.f32.mrf.mxu0 }
  0xc6   :  { %v128_v9 = vadd.f32 %v478_v6, %v120_v7 }
  0xc8   :  { %v130_v10 = vmul.f32 0.01, %v128_v9  ;;  %vm129_vm2 = vcmp.ge.f32.partialorder %v128_v9, 0.0 }
  0xca   :  { %v131_v11 = vsel %vm129_vm2, %v128_v9, %v130_v10 }
  0xcb   :  { %496 = vmatmul.mubr.msk.f32.vlgmr.msra.gmra.mxu1 %vm39_vm0, %v131_v11 }
  0xcc   :  { %372 = vmatprep.mubr.f32.mxu1 %v501_v0  ;;  %337 = vmatpush1.msra.mxu1 %v231_v15 }
  0xcd   :  { %338 = vmatprep.subr.mxu1 %v228_v17 }
  0xce   :  { %339 = vmatpush1.msra.mxu1 %v227_v19 }
 0x18b   :  { %v202_v21 = vpop.f32.mrf.mxu1 }
 0x18c   :  { %v213_v23 = vmul.f32 %v480_v20, %v202_v21 }
 0x18d   :  { %v497_v24 = vpop.f32.mrf.mxu1 }
 0x18e   :  { %v221_v25 = vadd.f32 %v481_v22, %v213_v23 }
 0x190   :  { %vm222_vm3 = vcmp.ge.f32.partialorder %v221_v25, 0.0  ;;  %v223_v26 = vmul.f32 0.01, %v221_v25 }
 0x192   :  { %v224_v27 = vsel %vm222_vm3, %v221_v25, %v223_v26 }
 0x193   :  { %482 = vmatmul.mubr.msk.f32.vlgmr.msra.gmra.mxu0 %vm233_vm4, %v224_v27  ;;  %444 = vst.msk [vmem:[%s631_s10] sm:$0x3] %vm443_vm5, %v224_v27  ;;  %483 = vmatmul.mubr.msk.f32.vlgmr.msra.gmra.mxu1 %vm233_vm4, %v224_v27 }
 0x253   :  { %v303_v42 = vpop.f32.mrf.mxu0  ;;  %v374_v43 = vpop.f32.mrf.mxu1 }
 0x254   :  { %v401_v44 = vmul.f32 %v384_v36, %v303_v42  ;;  %v403_v45 = vmul.f32 %v392_v37, %v374_v43 }
 0x255   :  { %v305_v48 = vpop.f32.mrf.mxu0  ;;  %v376_v50 = vpop.f32.mrf.mxu1 }
 0x256   :  { %v427_v52 = vadd.f32 %v410_v38, %v401_v44  ;;  %v429_v53 = vadd.f32 %v418_v39, %v403_v45  ;;  %v402_v54 = vmul.f32 %v388_v40, %v305_v48  ;;  %v404_v55 = vmul.f32 %v396_v41, %v376_v50 }
 0x258   :  { %v435_v57 = vmul.f32 0.01, %v427_v52  ;;  %v437_v58 = vmul.f32 0.01, %v429_v53  ;;  %v428_v59 = vadd.f32 %v414_v49, %v402_v54  ;;  %v430_v60 = vadd.f32 %v422_v51, %v404_v55 }
 0x259   :  { %vm431_vm6 = vcmp.ge.f32.partialorder %v427_v52, 0.0  ;;  %vm433_vm7 = vcmp.ge.f32.partialorder %v429_v53, 0.0 }
 0x25a   :  { %vm432_vm8 = vcmp.ge.f32.partialorder %v428_v59, 0.0  ;;  %v436_v61 = vmul.f32 0.01, %v428_v59  ;;  %vm434_vm9 = vcmp.ge.f32.partialorder %v430_v60, 0.0  ;;  %v438_v62 = vmul.f32 0.01, %v430_v60 }
 0x25b   :  { %v439_v0 = vsel %vm431_vm6, %v427_v52, %v435_v57  ;;  %v441_v1 = vsel %vm433_vm7, %v429_v53, %v437_v58 }
 0x25c   :  { %v440_v2 = vsel %vm432_vm8, %v428_v59, %v436_v61  ;;  %v442_v3 = vsel %vm434_vm9, %v430_v60, %v438_v62 }
 0x25d   :  { %v449_v4 = vcombine.low %v439_v0, %v440_v2  ;;  %v450_v5 = vcombine.low %v441_v1, %v442_v3 }
 0x25f   :  { %v457_v6 = vrot.slane %v449_v4, %v456_v63  ;;  %v464_v7 = vrot.slane %v450_v5, %v456_v63 }
 0x261   :  { %v465_v8 = vcombine.low %v457_v6, %v464_v7 }
 0x263   :  { %467 = vst [vmem:[%s634_s11] sm:$0xff] %v465_v8 }

</bundles_post_ra>
